<compile_context>
chip_gen: v6e
topology: v6e:2x2x1
jax: 0.10.0
libtpu: 0.0.40
codegen_flags: <defaults>
</compile_context>

<pallas_src>
import numpy as np
import jax
import jax.numpy as jnp
from jax.experimental import pallas as pl
from jax.experimental.pallas import tpu as pltpu


def _rup(x, m):
    return (x + m - 1) // m * m


# ----------------------------------------------------------------------------
# Backend capability probe for the K-folded (minor-dim concatenation) path
# ----------------------------------------------------------------------------
_KFOLD_CACHE = None


def _probe_lane_concat():
    def kern(x_ref, o_ref):
        parts = [x_ref[...] * float(t + 1) for t in range(9)]
        o_ref[...] = jnp.concatenate(parts, axis=1)

    try:
        x = jnp.ones((64, 16), jnp.bfloat16)
        out = pl.pallas_call(
            kern, out_shape=jax.ShapeDtypeStruct((64, 144), jnp.bfloat16))(x)
        out = np.asarray(jax.block_until_ready(out)).astype(np.float32)
        exp = np.concatenate(
            [np.full((64, 16), t + 1, np.float32) for t in range(9)], axis=1)
        return bool(np.array_equal(out, exp))
    except Exception:
        return False


def _kfold_enabled():
    global _KFOLD_CACHE
    if _KFOLD_CACHE is None:
        _KFOLD_CACHE = _probe_lane_concat()
    return _KFOLD_CACHE


# ----------------------------------------------------------------------------
# In-plane (3x3, pad 1) tap bookkeeping
# ----------------------------------------------------------------------------
def hw_tap_setup(H, W):
    """Static slice offsets + W-boundary mask for the 9 taps of a 3x3 in-plane kernel.

    The kernel keeps a VMEM copy of the flat (H*W, C) plane with `padr` zero rows above
    and below (padr = W+1 rounded up to a sublane multiple); tap (dh, dw) is the static
    row slice starting at padr-(W+1) + (dh+1)*W + (dw+1).  Rows falling off the top /
    bottom land in the zero strips; the W (and corner) boundary is handled by the mask.
    """
    padr = _rup(W + 1, 8)
    base = padr - (W + 1)
    offs, needs_mask, cols = [], [], []
    w_idx = np.arange(H * W) % W
    for b in range(3):
        for c in range(3):
            offs.append(base + b * W + c)
            needs_mask.append(c != 1)
            wc = w_idx + (c - 1)
            cols.append(((wc >= 0) & (wc < W)).astype(np.float32))
    mask = jnp.asarray(np.stack(cols, axis=1), dtype=jnp.bfloat16)   # (HW, 9)
    return tuple(offs), tuple(needs_mask), mask, padr


# ----------------------------------------------------------------------------
# Shared in-kernel helper: one depth tap's 3x3 (or 1x1) in-plane conv as a matmul
# ----------------------------------------------------------------------------
def _plane_conv(plane, w2d, pad_ref, mask_ref, *, offs, needs_mask, padr, HW, Cin,
                khw, kfold):
    if khw == 1:
        return jnp.dot(plane, w2d, preferred_element_type=jnp.float32)
    # H zero-padding in VMEM (aligned interior store; strips pre-zeroed by caller)
    pad_ref[padr:padr + HW, :] = plane
    parts = []
    for t in range(khw):
        sl = pad_ref[offs[t]:offs[t] + HW, :]
        if needs_mask[t]:
            sl = sl * mask_ref[:, t:t + 1]
        parts.append(sl)
    if kfold:
        lhs = jnp.concatenate(parts, axis=1)           # (HW, khw*Cin) bf16
        return jnp.dot(lhs, w2d, preferred_element_type=jnp.float32)
    acc = None                                         # fallback: per-tap dots
    for t in range(khw):
        p = jnp.dot(parts[t], w2d[t * Cin:(t + 1) * Cin, :],
                    preferred_element_type=jnp.float32)
        acc = p if acc is None else acc + p
    return acc


# ----------------------------------------------------------------------------
# Kernel factories
# ----------------------------------------------------------------------------
def _make_conv_hw_kernel(*, khw, offs, needs_mask, padr, HW, Cin, kfold):
    """Conv3d kernel (1,3,3), pad (0,1,1): one (n, d) output plane per grid step."""

    def kernel(x_ref, w_ref, mask_ref, y_ref, st_ref, pad_ref):
        pad_ref[...] = jnp.zeros_like(pad_ref)
        acc = _plane_conv(x_ref[0, 0], w_ref[...], pad_ref, mask_ref,
                          offs=offs, needs_mask=needs_mask, padr=padr,
                          HW=HW, Cin=Cin, khw=khw, kfold=kfold)
        # fused per-plane partial BN statistics (pre-activation)
        st_ref[0, 0, 0:1, :] = jnp.sum(acc, axis=0, keepdims=True)
        st_ref[0, 0, 1:2, :] = jnp.sum(acc * acc, axis=0, keepdims=True)
        y_ref[0, 0] = acc.astype(y_ref.dtype)

    return kernel


def _make_conv_d3_kernel(*, khw, offs, needs_mask, padr, HW, Cin, D,
                         has_mask, has_aff, relu_out, out_cols, kfold):
    """Conv3d kernel with kd == 3 ((3,3,3) pad 1 or (3,1,1) pad (1,0,0)).

    Uses a rolling 4-slot VMEM ring over depth planes (manual DMA): each input plane is
    fetched from HBM exactly once per conv, with a one-grid-step prefetch.
    """
    RING = 4

    def kernel(*refs):
        i = 0
        x_hbm = refs[i]; i += 1
        w_ref = refs[i]; i += 1
        mask_ref = None
        if has_mask:
            mask_ref = refs[i]; i += 1
        sc_ref = sh_ref = None
        if has_aff:
            sc_ref, sh_ref = refs[i], refs[i + 1]; i += 2
        y_ref, st_ref = refs[i], refs[i + 1]; i += 2
        ring, sem = refs[i], refs[i + 1]; i += 2
        pad_ref = None
        if khw > 1:
            pad_ref = refs[i]; i += 1
        acc_ref = refs[i]

        n = pl.program_id(0)
        d = pl.program_id(1)
        base = n * D                                   # x_hbm is (N*D, HW, Cin)

        def slot(k):
            return k & (RING - 1)

        def start_fetch(k):
            pltpu.make_async_copy(x_hbm.at[base + k], ring.at[slot(k)],
                                  sem.at[slot(k)]).start()

        def wait_fetch(k):
            pltpu.make_async_copy(x_hbm.at[base + k], ring.at[slot(k)],
                                  sem.at[slot(k)]).wait()

        # --- rolling depth window: each plane DMA'd once, prefetched one step ahead ---
        @pl.when(d == 0)
        def _():
            start_fetch(0)
            if D > 1:
                start_fetch(1)
            wait_fetch(0)
            if D > 1:
                wait_fetch(1)
            if D > 2:
                start_fetch(2)                         # prefetch for step d == 1

        @pl.when(jnp.logical_and(d > 0, d + 1 < D))
        def _():
            wait_fetch(d + 1)                          # started at step d - 1

        @pl.when(jnp.logical_and(d > 0, d + 2 < D))
        def _():
            start_fetch(d + 2)                         # slot of plane d-2 is dead now

        if khw > 1:
            pad_ref[...] = jnp.zeros_like(pad_ref)
        acc_ref[...] = jnp.zeros_like(acc_ref)

        for a in range(3):                             # depth taps
            src = d + (a - 1)
            valid = jnp.logical_and(src >= 0, src < D)

            @pl.when(valid)                            # skip out-of-range taps entirely
            def _(a=a, src=src):
                plane = ring[slot(src)]                # (HW, Cin) bf16
                if has_aff:
                    # fused BN+ReLU of the previous conv, applied to its raw output
                    p32 = plane.astype(jnp.float32) * sc_ref[...] + sh_ref[...]
                    plane = jnp.maximum(p32, 0.0).astype(ring.dtype)
                acc_ref[...] += _plane_conv(plane, w_ref[a], pad_ref, mask_ref,
                                            offs=offs, needs_mask=needs_mask,
                                            padr=padr, HW=HW, Cin=Cin, khw=khw,
                                            kfold=kfold)

        acc = acc_ref[...]
        # fused per-plane partial BN statistics (pre-activation)
        st_ref[0, 0, 0:1, :] = jnp.sum(acc, axis=0, keepdims=True)
        st_ref[0, 0, 1:2, :] = jnp.sum(acc * acc, axis=0, keepdims=True)
        if relu_out:
            acc = jnp.maximum(acc, 0.0)
        y_ref[0, 0] = acc[:, :out_cols].astype(y_ref.dtype)

    return kernel


def _affine_kernel(x_ref, s_ref, b_ref, o_ref):
    y = x_ref[...].astype(jnp.float32) * s_ref[...] + b_ref[...]
    o_ref[...] = jnp.maximum(y, 0.0).astype(o_ref.dtype)


def _affine_res_kernel(x_ref, s_ref, b_ref, r_ref, o_ref):
    y = (x_ref[...].astype(jnp.float32) * s_ref[...] + b_ref[...]
         + r_ref[...].astype(jnp.float32))
    o_ref[...] = jnp.maximum(y, 0.0).astype(o_ref.dtype)


# ----------------------------------------------------------------------------
# Wrappers
# ----------------------------------------------------------------------------
def conv3d_plane(x, wp, *, H, W, taps, out_dtype=jnp.bfloat16):
    """Conv3d (1,3,3), pad (0,1,1), no bias. x:(N,D,HW,Cin); wp:(9*Cin,Coutp) bf16."""
    N, D, HW, Cin = x.shape
    K, Coutp = wp.shape
    offs, needs_mask, mask, padr = taps
    assert HW == H * W and K == 9 * Cin
    kern = _make_conv_hw_kernel(khw=9, offs=offs, needs_mask=needs_mask, padr=padr,
                                HW=HW, Cin=Cin, kfold=_kfold_enabled())
    out_shape = (jax.ShapeDtypeStruct((N, D, HW, Coutp), out_dtype),
                 jax.ShapeDtypeStruct((N, D, 2, Coutp), jnp.float32))
    y, stats = pl.pallas_call(
        kern,
        out_shape=out_shape,
        grid_spec=pltpu.PrefetchScalarGridSpec(
            num_scalar_prefetch=0, grid=(N, D),
            in_specs=[pl.BlockSpec((1, 1, HW, Cin), lambda n, d: (n, d, 0, 0)),
                      pl.BlockSpec((K, Coutp), lambda n, d: (0, 0)),
                      pl.BlockSpec((HW, 9), lambda n, d: (0, 0))],
            out_specs=(pl.BlockSpec((1, 1, HW, Coutp), lambda n, d: (n, d, 0, 0)),
                       pl.BlockSpec((1, 1, 2, Coutp), lambda n, d: (n, d, 0, 0))),
            scratch_shapes=[pltpu.VMEM((HW + 2 * padr, Cin), x.dtype)]),
        compiler_params=pltpu.CompilerParams(
            dimension_semantics=("parallel", "parallel"),
            vmem_limit_bytes=32 * 1024 * 1024),
    )(x, wp, mask)
    return y, stats


def conv3d_depth3(x, wp, *, H, W, taps=None, in_scale=None, in_shift=None,
                  relu_out=False, out_cols=None, out_dtype=jnp.bfloat16):
    """Conv3d with kd == 3 ((3,3,3) pad 1 if taps given, else (3,1,1) pad (1,0,0))."""
    N, D, HW, Cin = x.shape
    KD, K, Coutp = wp.shape
    assert KD == 3 and HW == H * W
    if taps is not None:
        offs, needs_mask, mask, padr = taps
        khw = 9
    else:
        offs = needs_mask = mask = None
        padr, khw = 0, 1
    assert K == khw * Cin
    has_mask = mask is not None
    has_aff = in_scale is not None
    if out_cols is None:
        out_cols = Coutp

    kern = _make_conv_d3_kernel(khw=khw, offs=offs, needs_mask=needs_mask, padr=padr,
                                HW=HW, Cin=Cin, D=D, has_mask=has_mask,
                                has_aff=has_aff, relu_out=relu_out,
                                out_cols=out_cols, kfold=_kfold_enabled())

    inputs = [x.reshape(N * D, HW, Cin), wp]
    in_specs = [pl.BlockSpec(memory_space=pl.ANY),          # raw HBM ref, manual DMA
                pl.BlockSpec((3, K, Coutp), lambda n, d: (0, 0, 0))]
    if has_mask:
        inputs.append(mask)
        in_specs.append(pl.BlockSpec((HW, 9), lambda n, d: (0, 0)))
    if has_aff:
        inputs.append(in_scale.reshape(1, Cin).astype(jnp.float32))
        in_specs.append(pl.BlockSpec((1, Cin), lambda n, d: (0, 0)))
        inputs.append(in_shift.reshape(1, Cin).astype(jnp.float32))
        in_specs.append(pl.BlockSpec((1, Cin), lambda n, d: (0, 0)))

    out_shape = (jax.ShapeDtypeStruct((N, D, HW, out_cols), out_dtype),
                 jax.ShapeDtypeStruct((N, D, 2, Coutp), jnp.float32))
    out_specs = (pl.BlockSpec((1, 1, HW, out_cols), lambda n, d: (n, d, 0, 0)),
                 pl.BlockSpec((1, 1, 2, Coutp), lambda n, d: (n, d, 0, 0)))

    scratch = [pltpu.VMEM((4, HW, Cin), x.dtype),           # rolling depth ring
               pltpu.SemaphoreType.DMA((4,))]
    if khw > 1:
        scratch.append(pltpu.VMEM((HW + 2 * padr, Cin), x.dtype))   # H-padded plane
    scratch.append(pltpu.VMEM((HW, Coutp), jnp.float32))            # f32 accumulator

    y, stats = pl.pallas_call(
        kern,
        out_shape=out_shape,
        grid_spec=pltpu.PrefetchScalarGridSpec(
            num_scalar_prefetch=0, grid=(N, D),
            in_specs=in_specs, out_specs=out_specs, scratch_shapes=scratch),
        compiler_params=pltpu.CompilerParams(
            dimension_semantics=("parallel", "arbitrary"),
            vmem_limit_bytes=32 * 1024 * 1024),
    )(*inputs)
    return y, stats


def affine_p(y, scale, shift, residual=None, out_dtype=jnp.bfloat16):
    """Fused BN-apply: relu(y*scale + shift [+ residual]) on (N, D, HW, C).

    The (M, C) tensor is viewed as a lane-dense (M*C/128, 128) slab (free reshape),
    with scale/shift tiled 128/C times -> every load/store fills all 128 lanes.
    """
    N, D, HW, C = y.shape
    total = N * D * HW * C
    assert 128 % C == 0 and total % 128 == 0, "lane-dense BN-apply needs C|128, 128|numel"
    R = total // 128
    reps = 128 // C
    tm = R
    if R > 1024:
        tm = 0
        for t in range(1024, 7, -8):
            if R % t == 0:
                tm = t
                break
        if tm == 0:
            tm = R
    yf = y.reshape(R, 128)
    s2 = jnp.tile(scale.astype(jnp.float32), reps).reshape(1, 128)
    b2 = jnp.tile(shift.astype(jnp.float32), reps).reshape(1, 128)
    inputs = [yf, s2, b2]
    in_specs = [pl.BlockSpec((tm, 128), lambda i: (i, 0)),
                pl.BlockSpec((1, 128), lambda i: (0, 0)),
                pl.BlockSpec((1, 128), lambda i: (0, 0))]
    if residual is not None:
        inputs.append(residual.reshape(R, 128))
        in_specs.append(pl.BlockSpec((tm, 128), lambda i: (i, 0)))
        kern = _affine_res_kernel
    else:
        kern = _affine_kernel
    out = pl.pallas_call(
        kern,
        out_shape=jax.ShapeDtypeStruct((R, 128), out_dtype),
        grid_spec=pltpu.PrefetchScalarGridSpec(
            num_scalar_prefetch=0, grid=(R // tm,),
            in_specs=in_specs,
            out_specs=pl.BlockSpec((tm, 128), lambda i: (i, 0))),
        compiler_params=pltpu.CompilerParams(dimension_semantics=("parallel",)),
    )(*inputs)
    return out.reshape(N, D, HW, C)


# ----------------------------------------------------------------------------
# JAX glue (layout plumbing only)
# ----------------------------------------------------------------------------
def upsample2(x, H, W):
    """Nearest 2x upsample in D, H, W on (N, D, H*W, C): one broadcast + reshape."""
    N, D, HW, C = x.shape
    x5 = x.reshape(N, D, 1, H, 1, W, 1, C)
    x8 = jnp.broadcast_to(x5, (N, D, 2, H, 2, W, 2, C))
    return x8.reshape(N, 2 * D, 4 * HW, C)


def bn_scale_shift(stats, count, gamma, beta, eps=1e-5):
    """Training-mode BatchNorm scale/shift from the conv kernels' fused partial stats."""
    s = jnp.sum(stats, axis=(0, 1))                        # (2, Coutp)
    C = gamma.shape[0]
    mean = s[0, :C] / count
    var = jnp.maximum(s[1, :C] / count - mean * mean, 0.0)  # biased, like PyTorch
    scale = gamma / jnp.sqrt(var + eps)
    shift = beta - mean * scale
    return scale, shift


# ----------------------------------------------------------------------------
# Parameters mirroring Generator_3DSTResNetDecoder.__init__ (weights pre-packed)
# ----------------------------------------------------------------------------
def init_generator_params(key, input_shape=(2, 2, 2), input_nc=16,
                          output_shape=(8, 8, 8), output_nc=1, n_blocks=1):
    assert input_shape[0] == input_shape[1] == input_shape[2]
    assert output_shape[0] == output_shape[1] == output_shape[2]
    max_up = int(np.max(np.log2(np.asarray(output_shape, np.float64) /
                                np.asarray(input_shape, np.float64))))
    max_down = int(np.log2(input_nc / output_nc))
    assert max_up < max_down, "upsampling overstep border"

    state = {"key": key}

    def nk():
        state["key"], sub = jax.random.split(state["key"])
        return sub

    def conv_packed(cout, cin, ks, cout_pad=None):
        kd, kh, kw = ks
        fan_in = cin * kd * kh * kw
        w = jax.random.normal(nk(), (cout, cin, kd, kh, kw), jnp.float32) / np.sqrt(fan_in)
        # pre-packed MXU layout: (kd, kh*kw*cin, cout), rows ordered (kh, kw, cin)
        wp = jnp.transpose(w, (2, 3, 4, 1, 0)).reshape(kd, kh * kw * cin, cout)
        cp = cout_pad if cout_pad is not None else cout
        if cp > cout:
            wp = jnp.pad(wp, ((0, 0), (0, 0), (0, cp - cout)))
        return wp.astype(jnp.bfloat16)

    def bn_p(c):
        return {"gamma": 1.0 + 0.1 * jax.random.normal(nk(), (c,), jnp.float32),
                "beta": 0.1 * jax.random.normal(nk(), (c,), jnp.float32)}

    def res_block(c):
        return {"w1": conv_packed(c, c, (1, 3, 3))[0], "bn1": bn_p(c),
                "w2": conv_packed(c, c, (3, 1, 1)), "bn2": bn_p(c)}

    def up_block(cin, cout, up_sample, up_conv):
        p = {"up_sample": up_sample, "up_conv": up_conv, "res": []}
        if up_sample:
            p["w_up"] = conv_packed(cout, cin, (3, 3, 3))
            p["bn_up"] = bn_p(cout)
        if up_conv:
            p["res"] = [res_block(cout) for _ in range(n_blocks)]
        return p

    stages = [up_block(input_nc, input_nc, False, True)]
    out_channel = input_nc
    for _ in range(max_up - 1):
        in_channel = out_channel
        out_channel = in_channel // 2
        stages.append(up_block(in_channel, out_channel, True, True))
    in_channel = out_channel
    out_channel = in_channel // 2
    stages.append(up_block(in_channel, out_channel, True, False))
    # final conv: Cout = output_nc, padded to 8 for the MXU; only column 0 is stored.
    w_out = conv_packed(output_nc, out_channel, (3, 3, 3), cout_pad=8)
    return {"stages": stages, "w_out": w_out, "output_nc": output_nc}


# ----------------------------------------------------------------------------
# Forward pass
# ----------------------------------------------------------------------------
def generator_forward(params, x_ncdhw):
    N, C, D, H, W = x_ncdhw.shape
    x = jnp.transpose(x_ncdhw.astype(jnp.float32), (0, 2, 3, 4, 1))
    x = x.reshape(N, D, H * W, C).astype(jnp.bfloat16)      # NDHWC, flat HW, bf16

    for st in params["stages"]:
        if st["up_sample"]:
            x = upsample2(x, H, W)
            D, H, W = 2 * D, 2 * H, 2 * W
            taps = hw_tap_setup(H, W)
            y, stats = conv3d_depth3(x, st["w_up"], H=H, W=W, taps=taps)
            sc, sh = bn_scale_shift(stats, N * D * H * W,
                                    st["bn_up"]["gamma"], st["bn_up"]["beta"])
            x = affine_p(y, sc, sh)                          # BN + ReLU
        if st["up_conv"]:
            taps = hw_tap_setup(H, W)
            for rp in st["res"]:
                # conv (1,3,3): one K-folded MXU matmul per plane + fused BN stats
                raw1, st1 = conv3d_plane(x, rp["w1"], H=H, W=W, taps=taps)
                sc1, sh1 = bn_scale_shift(st1, N * D * H * W,
                                          rp["bn1"]["gamma"], rp["bn1"]["beta"])
                # conv (3,1,1): reads raw1 with BN1 + ReLU fused into its input stage
                raw2, st2 = conv3d_depth3(raw1, rp["w2"], H=H, W=W,
                                          in_scale=sc1, in_shift=sh1)
                sc2, sh2 = bn_scale_shift(st2, N * D * H * W,
                                          rp["bn2"]["gamma"], rp["bn2"]["beta"])
                # BN2 + residual add + ReLU (also covers the block's trailing ReLU)
                x = affine_p(raw2, sc2, sh2, residual=x)

    # final Conv3d (bias-free) with fused out_activation ReLU; single-channel output
    taps = hw_tap_setup(H, W)
    y, _ = conv3d_depth3(x, params["w_out"], H=H, W=W, taps=taps, relu_out=True,
                         out_cols=params["output_nc"], out_dtype=jnp.float32)
    out_nc = params["output_nc"]
    y = y.reshape(N, D, H, W, out_nc)
    return jnp.transpose(y, (0, 4, 1, 2, 3))                 # back to NCDHW


if __name__ == "__main__":
    key = jax.random.PRNGKey(0)
    pkey, xkey = jax.random.split(key)

    # Small, structure-preserving config: 2^3 spatial / 16 ch  ->  8^3 spatial / 1 ch
    input_shape, input_nc = (2, 2, 2), 16
    output_shape, output_nc = (8, 8, 8), 1
    n_blocks = 1

    params = init_generator_params(pkey, input_shape, input_nc,
                                   output_shape, output_nc, n_blocks)
    x = jax.random.normal(xkey, (2, input_nc) + input_shape, jnp.float32)

    y = generator_forward(params, x)
    y = jax.block_until_ready(y)

    assert y.shape == (2, output_nc) + output_shape, y.shape
    assert bool(jnp.all(jnp.isfinite(y)))
    assert bool(jnp.all(y >= 0.0))        # final ReLU
    print("KERNEL_OK")
</pallas_src>

<mosaic_0001>
module attributes {stable_mosaic.version = 11 : i64} {
  func.func @kern(%arg0: memref<64x16xbf16, #tpu.memory_space<vmem>>, %arg1: memref<64x144xbf16, #tpu.memory_space<vmem>>) attributes {dimension_semantics = [], scalar_prefetch = 0 : i64, scratch_operands = 0 : i64, tpu.core_type = #tpu.core_type<tc>} {
    %c0 = arith.constant 0 : index
    %c0_0 = arith.constant 0 : index
    %0 = vector.load %arg0[%c0, %c0_0] : memref<64x16xbf16, #tpu.memory_space<vmem>>, vector<64x16xbf16>
    %cst = arith.constant 1.000000e+00 : bf16
    %1 = vector.broadcast %cst : bf16 to vector<64x16xbf16>
    %2 = arith.mulf %0, %1 : vector<64x16xbf16>
    %c0_1 = arith.constant 0 : index
    %c0_2 = arith.constant 0 : index
    %3 = vector.load %arg0[%c0_1, %c0_2] : memref<64x16xbf16, #tpu.memory_space<vmem>>, vector<64x16xbf16>
    %cst_3 = arith.constant 2.000000e+00 : bf16
    %4 = vector.broadcast %cst_3 : bf16 to vector<64x16xbf16>
    %5 = arith.mulf %3, %4 : vector<64x16xbf16>
    %c0_4 = arith.constant 0 : index
    %c0_5 = arith.constant 0 : index
    %6 = vector.load %arg0[%c0_4, %c0_5] : memref<64x16xbf16, #tpu.memory_space<vmem>>, vector<64x16xbf16>
    %cst_6 = arith.constant 3.000000e+00 : bf16
    %7 = vector.broadcast %cst_6 : bf16 to vector<64x16xbf16>
    %8 = arith.mulf %6, %7 : vector<64x16xbf16>
    %c0_7 = arith.constant 0 : index
    %c0_8 = arith.constant 0 : index
    %9 = vector.load %arg0[%c0_7, %c0_8] : memref<64x16xbf16, #tpu.memory_space<vmem>>, vector<64x16xbf16>
    %cst_9 = arith.constant 4.000000e+00 : bf16
    %10 = vector.broadcast %cst_9 : bf16 to vector<64x16xbf16>
    %11 = arith.mulf %9, %10 : vector<64x16xbf16>
    %c0_10 = arith.constant 0 : index
    %c0_11 = arith.constant 0 : index
    %12 = vector.load %arg0[%c0_10, %c0_11] : memref<64x16xbf16, #tpu.memory_space<vmem>>, vector<64x16xbf16>
    %cst_12 = arith.constant 5.000000e+00 : bf16
    %13 = vector.broadcast %cst_12 : bf16 to vector<64x16xbf16>
    %14 = arith.mulf %12, %13 : vector<64x16xbf16>
    %c0_13 = arith.constant 0 : index
    %c0_14 = arith.constant 0 : index
    %15 = vector.load %arg0[%c0_13, %c0_14] : memref<64x16xbf16, #tpu.memory_space<vmem>>, vector<64x16xbf16>
    %cst_15 = arith.constant 6.000000e+00 : bf16
    %16 = vector.broadcast %cst_15 : bf16 to vector<64x16xbf16>
    %17 = arith.mulf %15, %16 : vector<64x16xbf16>
    %c0_16 = arith.constant 0 : index
    %c0_17 = arith.constant 0 : index
    %18 = vector.load %arg0[%c0_16, %c0_17] : memref<64x16xbf16, #tpu.memory_space<vmem>>, vector<64x16xbf16>
    %cst_18 = arith.constant 7.000000e+00 : bf16
    %19 = vector.broadcast %cst_18 : bf16 to vector<64x16xbf16>
    %20 = arith.mulf %18, %19 : vector<64x16xbf16>
    %c0_19 = arith.constant 0 : index
    %c0_20 = arith.constant 0 : index
    %21 = vector.load %arg0[%c0_19, %c0_20] : memref<64x16xbf16, #tpu.memory_space<vmem>>, vector<64x16xbf16>
    %cst_21 = arith.constant 8.000000e+00 : bf16
    %22 = vector.broadcast %cst_21 : bf16 to vector<64x16xbf16>
    %23 = arith.mulf %21, %22 : vector<64x16xbf16>
    %c0_22 = arith.constant 0 : index
    %c0_23 = arith.constant 0 : index
    %24 = vector.load %arg0[%c0_22, %c0_23] : memref<64x16xbf16, #tpu.memory_space<vmem>>, vector<64x16xbf16>
    %cst_24 = arith.constant 9.000000e+00 : bf16
    %25 = vector.broadcast %cst_24 : bf16 to vector<64x16xbf16>
    %26 = arith.mulf %24, %25 : vector<64x16xbf16>
    %27 = tpu.concatenate %2, %5, %8, %11, %14, %17, %20, %23, %26 in 1 : vector<64x16xbf16>, vector<64x16xbf16>, vector<64x16xbf16>, vector<64x16xbf16>, vector<64x16xbf16>, vector<64x16xbf16>, vector<64x16xbf16>, vector<64x16xbf16>, vector<64x16xbf16> -> vector<64x144xbf16>
    %c0_25 = arith.constant 0 : index
    %c0_26 = arith.constant 0 : index
    %28 = vector.load %arg1[%c0_25, %c0_26] : memref<64x144xbf16, #tpu.memory_space<vmem>>, vector<64x144xbf16>
    tpu.vector_store %arg1[%c0_25, %c0_26], %27 {strides = array<i32>} : memref<64x144xbf16, #tpu.memory_space<vmem>>, vector<64x144xbf16>,
    return
  }
}

module attributes {stable_mosaic.version = 11 : i64} {
  func.func @kernel(%arg0: i32, %arg1: i32, %arg2: memref<1x1x4x16xbf16, #tpu.memory_space<vmem>>, %arg3: memref<144x16xbf16, #tpu.memory_space<vmem>>, %arg4: memref<4x9xbf16, #tpu.memory_space<vmem>>, %arg5: memref<1x1x4x16xbf16, #tpu.memory_space<vmem>>, %arg6: memref<1x1x2x16xf32, #tpu.memory_space<vmem>>, %arg7: memref<20x16xbf16, #tpu.memory_space<vmem>>) attributes {dimension_semantics = [#tpu.dimension_semantics<parallel>, #tpu.dimension_semantics<parallel>], iteration_bounds = array<i64: 2, 2>, scalar_prefetch = 0 : i64, scratch_operands = 1 : i64, tpu.core_type = #tpu.core_type<tc>, window_params = [{transform_indices = @transform_0, window_bounds = array<i64: 1, 1, 4, 16>}, {pipeline_mode = #tpu.pipeline_mode<synchronous>, transform_indices = @transform_1, window_bounds = array<i64: 144, 16>}, {pipeline_mode = #tpu.pipeline_mode<synchronous>, transform_indices = @transform_2, window_bounds = array<i64: 4, 9>}, {transform_indices = @transform_3, window_bounds = array<i64: 1, 1, 4, 16>}, {transform_indices = @transform_4, window_bounds = array<i64: 1, 1, 2, 16>}]} {
    %cst = arith.constant 0.000000e+00 : bf16
    %0 = vector.broadcast %cst : bf16 to vector<20x16xbf16>
    %c0 = arith.constant 0 : index
    %c0_0 = arith.constant 0 : index
    %1 = vector.load %arg7[%c0, %c0_0] : memref<20x16xbf16, #tpu.memory_space<vmem>>, vector<20x16xbf16>
    tpu.vector_store %arg7[%c0, %c0_0], %0 {strides = array<i32>} : memref<20x16xbf16, #tpu.memory_space<vmem>>, vector<20x16xbf16>,
    %c0_1 = arith.constant 0 : index
    %c0_2 = arith.constant 0 : index
    %c0_3 = arith.constant 0 : index
    %c0_4 = arith.constant 0 : index
    %2 = vector.load %arg2[%c0_1, %c0_2, %c0_3, %c0_4] : memref<1x1x4x16xbf16, #tpu.memory_space<vmem>>, vector<1x1x4x16xbf16>
    %3 = vector.shape_cast %2 : vector<1x1x4x16xbf16> to vector<4x16xbf16>
    %c0_5 = arith.constant 0 : index
    %c0_6 = arith.constant 0 : index
    %4 = vector.load %arg3[%c0_5, %c0_6] : memref<144x16xbf16, #tpu.memory_space<vmem>>, vector<144x16xbf16>
    %c8 = arith.constant 8 : index
    %c0_7 = arith.constant 0 : index
    %5 = vector.load %arg7[%c8, %c0_7] : memref<20x16xbf16, #tpu.memory_space<vmem>>, vector<4x16xbf16>
    tpu.vector_store %arg7[%c8, %c0_7], %3 {strides = array<i32>} : memref<20x16xbf16, #tpu.memory_space<vmem>>, vector<4x16xbf16>,
    %c5 = arith.constant 5 : index
    %c0_8 = arith.constant 0 : index
    %6 = vector.load %arg7[%c5, %c0_8] : memref<20x16xbf16, #tpu.memory_space<vmem>>, vector<4x16xbf16>
    %c0_9 = arith.constant 0 : index
    %c0_10 = arith.constant 0 : index
    %7 = vector.load %arg4[%c0_9, %c0_10] : memref<4x9xbf16, #tpu.memory_space<vmem>>, vector<4x1xbf16>
    %8 = vector.broadcast %7 : vector<4x1xbf16> to vector<4x16xbf16>
    %9 = arith.mulf %6, %8 : vector<4x16xbf16>
    %c6 = arith.constant 6 : index
    %c0_11 = arith.constant 0 : index
    %10 = vector.load %arg7[%c6, %c0_11] : memref<20x16xbf16, #tpu.memory_space<vmem>>, vector<4x16xbf16>
    %c7 = arith.constant 7 : index
    %c0_12 = arith.constant 0 : index
    %11 = vector.load %arg7[%c7, %c0_12] : memref<20x16xbf16, #tpu.memory_space<vmem>>, vector<4x16xbf16>
    %c0_13 = arith.constant 0 : index
    %c2 = arith.constant 2 : index
    %12 = vector.load %arg4[%c0_13, %c2] : memref<4x9xbf16, #tpu.memory_space<vmem>>, vector<4x1xbf16>
    %13 = vector.broadcast %12 : vector<4x1xbf16> to vector<4x16xbf16>
    %14 = arith.mulf %11, %13 : vector<4x16xbf16>
    %c7_14 = arith.constant 7 : index
    %c0_15 = arith.constant 0 : index
    %15 = vector.load %arg7[%c7_14, %c0_15] : memref<20x16xbf16, #tpu.memory_space<vmem>>, vector<4x16xbf16>
    %c0_16 = arith.constant 0 : index
    %c3 = arith.constant 3 : index
    %16 = vector.load %arg4[%c0_16, %c3] : memref<4x9xbf16, #tpu.memory_space<vmem>>, vector<4x1xbf16>
    %17 = vector.broadcast %16 : vector<4x1xbf16> to vector<4x16xbf16>
    %18 = arith.mulf %15, %17 : vector<4x16xbf16>
    %c8_17 = arith.constant 8 : index
    %c0_18 = arith.constant 0 : index
    %19 = vector.load %arg7[%c8_17, %c0_18] : memref<20x16xbf16, #tpu.memory_space<vmem>>, vector<4x16xbf16>
    %c9 = arith.constant 9 : index
    %c0_19 = arith.constant 0 : index
    %20 = vector.load %arg7[%c9, %c0_19] : memref<20x16xbf16, #tpu.memory_space<vmem>>, vector<4x16xbf16>
    %c0_20 = arith.constant 0 : index
    %c5_21 = arith.constant 5 : index
    %21 = vector.load %arg4[%c0_20, %c5_21] : memref<4x9xbf16, #tpu.memory_space<vmem>>, vector<4x1xbf16>
    %22 = vector.broadcast %21 : vector<4x1xbf16> to vector<4x16xbf16>
    %23 = arith.mulf %20, %22 : vector<4x16xbf16>
    %c9_22 = arith.constant 9 : index
    %c0_23 = arith.constant 0 : index
    %24 = vector.load %arg7[%c9_22, %c0_23] : memref<20x16xbf16, #tpu.memory_space<vmem>>, vector<4x16xbf16>
    %c0_24 = arith.constant 0 : index
    %c6_25 = arith.constant 6 : index
    %25 = vector.load %arg4[%c0_24, %c6_25] : memref<4x9xbf16, #tpu.memory_space<vmem>>, vector<4x1xbf16>
    %26 = vector.broadcast %25 : vector<4x1xbf16> to vector<4x16xbf16>
    %27 = arith.mulf %24, %26 : vector<4x16xbf16>
    %c10 = arith.constant 10 : index
    %c0_26 = arith.constant 0 : index
    %28 = vector.load %arg7[%c10, %c0_26] : memref<20x16xbf16, #tpu.memory_space<vmem>>, vector<4x16xbf16>
    %c11 = arith.constant 11 : index
    %c0_27 = arith.constant 0 : index
    %29 = vector.load %arg7[%c11, %c0_27] : memref<20x16xbf16, #tpu.memory_space<vmem>>, vector<4x16xbf16>
    %c0_28 = arith.constant 0 : index
    %c8_29 = arith.constant 8 : index
    %30 = vector.load %arg4[%c0_28, %c8_29] : memref<4x9xbf16, #tpu.memory_space<vmem>>, vector<4x1xbf16>
    %31 = vector.broadcast %30 : vector<4x1xbf16> to vector<4x16xbf16>
    %32 = arith.mulf %29, %31 : vector<4x16xbf16>
    %33 = vector.extract_strided_slice %4 {offsets = [0, 0], sizes = [16, 16], strides = [1, 1]} : vector<144x16xbf16> to vector<16x16xbf16>
    %cst_30 = arith.constant dense<0.000000e+00> : vector<4x16xf32>
    %34 = tpu.matmul %9, %33, %cst_30 {dimension_numbers = #tpu.dot_dimension_numbers<[1], [0], [0], [1], [0, 0, 1, 1], [], []>} : vector<4x16xbf16>, vector<16x16xbf16>, vector<4x16xf32> -> vector<4x16xf32>
    %35 = vector.extract_strided_slice %4 {offsets = [16, 0], sizes = [16, 16], strides = [1, 1]} : vector<144x16xbf16> to vector<16x16xbf16>
    %cst_31 = arith.constant dense<0.000000e+00> : vector<4x16xf32>
    %36 = tpu.matmul %10, %35, %cst_31 {dimension_numbers = #tpu.dot_dimension_numbers<[1], [0], [0], [1], [0, 0, 1, 1], [], []>} : vector<4x16xbf16>, vector<16x16xbf16>, vector<4x16xf32> -> vector<4x16xf32>
    %37 = arith.addf %34, %36 : vector<4x16xf32>
    %38 = vector.extract_strided_slice %4 {offsets = [32, 0], sizes = [16, 16], strides = [1, 1]} : vector<144x16xbf16> to vector<16x16xbf16>
    %cst_32 = arith.constant dense<0.000000e+00> : vector<4x16xf32>
    %39 = tpu.matmul %14, %38, %cst_32 {dimension_numbers = #tpu.dot_dimension_numbers<[1], [0], [0], [1], [0, 0, 1, 1], [], []>} : vector<4x16xbf16>, vector<16x16xbf16>, vector<4x16xf32> -> vector<4x16xf32>
    %40 = arith.addf %37, %39 : vector<4x16xf32>
    %41 = vector.extract_strided_slice %4 {offsets = [48, 0], sizes = [16, 16], strides = [1, 1]} : vector<144x16xbf16> to vector<16x16xbf16>
    %cst_33 = arith.constant dense<0.000000e+00> : vector<4x16xf32>
    %42 = tpu.matmul %18, %41, %cst_33 {dimension_numbers = #tpu.dot_dimension_numbers<[1], [0], [0], [1], [0, 0, 1, 1], [], []>} : vector<4x16xbf16>, vector<16x16xbf16>, vector<4x16xf32> -> vector<4x16xf32>
    %43 = arith.addf %40, %42 : vector<4x16xf32>
    %44 = vector.extract_strided_slice %4 {offsets = [64, 0], sizes = [16, 16], strides = [1, 1]} : vector<144x16xbf16> to vector<16x16xbf16>
    %cst_34 = arith.constant dense<0.000000e+00> : vector<4x16xf32>
    %45 = tpu.matmul %19, %44, %cst_34 {dimension_numbers = #tpu.dot_dimension_numbers<[1], [0], [0], [1], [0, 0, 1, 1], [], []>} : vector<4x16xbf16>, vector<16x16xbf16>, vector<4x16xf32> -> vector<4x16xf32>
    %46 = arith.addf %43, %45 : vector<4x16xf32>
    %47 = vector.extract_strided_slice %4 {offsets = [80, 0], sizes = [16, 16], strides = [1, 1]} : vector<144x16xbf16> to vector<16x16xbf16>
    %cst_35 = arith.constant dense<0.000000e+00> : vector<4x16xf32>
    %48 = tpu.matmul %23, %47, %cst_35 {dimension_numbers = #tpu.dot_dimension_numbers<[1], [0], [0], [1], [0, 0, 1, 1], [], []>} : vector<4x16xbf16>, vector<16x16xbf16>, vector<4x16xf32> -> vector<4x16xf32>
    %49 = arith.addf %46, %48 : vector<4x16xf32>
    %50 = vector.extract_strided_slice %4 {offsets = [96, 0], sizes = [16, 16], strides = [1, 1]} : vector<144x16xbf16> to vector<16x16xbf16>
    %cst_36 = arith.constant dense<0.000000e+00> : vector<4x16xf32>
    %51 = tpu.matmul %27, %50, %cst_36 {dimension_numbers = #tpu.dot_dimension_numbers<[1], [0], [0], [1], [0, 0, 1, 1], [], []>} : vector<4x16xbf16>, vector<16x16xbf16>, vector<4x16xf32> -> vector<4x16xf32>
    %52 = arith.addf %49, %51 : vector<4x16xf32>
    %53 = vector.extract_strided_slice %4 {offsets = [112, 0], sizes = [16, 16], strides = [1, 1]} : vector<144x16xbf16> to vector<16x16xbf16>
    %cst_37 = arith.constant dense<0.000000e+00> : vector<4x16xf32>
    %54 = tpu.matmul %28, %53, %cst_37 {dimension_numbers = #tpu.dot_dimension_numbers<[1], [0], [0], [1], [0, 0, 1, 1], [], []>} : vector<4x16xbf16>, vector<16x16xbf16>, vector<4x16xf32> -> vector<4x16xf32>
    %55 = arith.addf %52, %54 : vector<4x16xf32>
    %56 = vector.extract_strided_slice %4 {offsets = [128, 0], sizes = [16, 16], strides = [1, 1]} : vector<144x16xbf16> to vector<16x16xbf16>
    %cst_38 = arith.constant dense<0.000000e+00> : vector<4x16xf32>
    %57 = tpu.matmul %32, %56, %cst_38 {dimension_numbers = #tpu.dot_dimension_numbers<[1], [0], [0], [1], [0, 0, 1, 1], [], []>} : vector<4x16xbf16>, vector<16x16xbf16>, vector<4x16xf32> -> vector<4x16xf32>
    %58 = arith.addf %55, %57 : vector<4x16xf32>
    %cst_39 = arith.constant dense<0.000000e+00> : vector<16xf32>
    %59 = vector.multi_reduction <add>, %58, %cst_39 [0] : vector<4x16xf32> to vector<16xf32>
    %60 = vector.shape_cast %59 : vector<16xf32> to vector<1x16xf32>
    %c0_40 = arith.constant 0 : index
    %c0_41 = arith.constant 0 : index
    %c0_42 = arith.constant 0 : index
    %c0_43 = arith.constant 0 : index
    %61 = vector.load %arg6[%c0_40, %c0_41, %c0_42, %c0_43] : memref<1x1x2x16xf32, #tpu.memory_space<vmem>>, vector<1x1x1x16xf32>
    %62 = vector.shape_cast %61 : vector<1x1x1x16xf32> to vector<1x16xf32>
    %63 = vector.shape_cast %60 : vector<1x16xf32> to vector<1x1x1x16xf32>
    tpu.vector_store %arg6[%c0_40, %c0_41, %c0_42, %c0_43], %63 {strides = array<i32>} : memref<1x1x2x16xf32, #tpu.memory_space<vmem>>, vector<1x1x1x16xf32>,
    %64 = arith.mulf %58, %58 : vector<4x16xf32>
    %cst_44 = arith.constant dense<0.000000e+00> : vector<16xf32>
    %65 = vector.multi_reduction <add>, %64, %cst_44 [0] : vector<4x16xf32> to vector<16xf32>
    %66 = vector.shape_cast %65 : vector<16xf32> to vector<1x16xf32>
    %c0_45 = arith.constant 0 : index
    %c0_46 = arith.constant 0 : index
    %c1 = arith.constant 1 : index
    %c0_47 = arith.constant 0 : index
    %67 = vector.load %arg6[%c0_45, %c0_46, %c1, %c0_47] : memref<1x1x2x16xf32, #tpu.memory_space<vmem>>, vector<1x1x1x16xf32>
    %68 = vector.shape_cast %67 : vector<1x1x1x16xf32> to vector<1x16xf32>
    %69 = vector.shape_cast %66 : vector<1x16xf32> to vector<1x1x1x16xf32>
    tpu.vector_store %arg6[%c0_45, %c0_46, %c1, %c0_47], %69 {strides = array<i32>} : memref<1x1x2x16xf32, #tpu.memory_space<vmem>>, vector<1x1x1x16xf32>,
    %70 = arith.truncf %58 : vector<4x16xf32> to vector<4x16xbf16>
    %c0_48 = arith.constant 0 : index
    %c0_49 = arith.constant 0 : index
    %c0_50 = arith.constant 0 : index
    %c0_51 = arith.constant 0 : index
    %71 = vector.load %arg5[%c0_48, %c0_49, %c0_50, %c0_51] : memref<1x1x4x16xbf16, #tpu.memory_space<vmem>>, vector<1x1x4x16xbf16>
    %72 = vector.shape_cast %71 : vector<1x1x4x16xbf16> to vector<4x16xbf16>
    %73 = vector.shape_cast %70 : vector<4x16xbf16> to vector<1x1x4x16xbf16>
    tpu.vector_store %arg5[%c0_48, %c0_49, %c0_50, %c0_51], %73 {strides = array<i32>} : memref<1x1x4x16xbf16, #tpu.memory_space<vmem>>, vector<1x1x4x16xbf16>,
    return
  }
  func.func @transform_0(%arg0: i32, %arg1: i32) -> (i32, i32, i32, i32) {
    %c0_i32 = arith.constant 0 : i32
    %c0_i32_0 = arith.constant 0 : i32
    %c0_i32_1 = arith.constant 0 : i32
    return %arg0, %arg1, %c0_i32, %c0_i32_0 : i32, i32, i32, i32
  }
  func.func @transform_1(%arg0: i32, %arg1: i32) -> (i32, i32) {
    %c0_i32 = arith.constant 0 : i32
    %c0_i32_0 = arith.constant 0 : i32
    %c0_i32_1 = arith.constant 0 : i32
    return %c0_i32, %c0_i32_0 : i32, i32
  }
  func.func @transform_2(%arg0: i32, %arg1: i32) -> (i32, i32) {
    %c0_i32 = arith.constant 0 : i32
    %c0_i32_0 = arith.constant 0 : i32
    %c0_i32_1 = arith.constant 0 : i32
    return %c0_i32, %c0_i32_0 : i32, i32
  }
  func.func @transform_3(%arg0: i32, %arg1: i32) -> (i32, i32, i32, i32) {
    %c0_i32 = arith.constant 0 : i32
    %c0_i32_0 = arith.constant 0 : i32
    %c0_i32_1 = arith.constant 0 : i32
    return %arg0, %arg1, %c0_i32, %c0_i32_0 : i32, i32, i32, i32
  }
  func.func @transform_4(%arg0: i32, %arg1: i32) -> (i32, i32, i32, i32) {
    %c0_i32 = arith.constant 0 : i32
    %c0_i32_0 = arith.constant 0 : i32
    %c0_i32_1 = arith.constant 0 : i32
    return %arg0, %arg1, %c0_i32, %c0_i32_0 : i32, i32, i32, i32
  }
}

</mosaic_0001>

<bundles_post_ra>
// kernel: tpu_custom_call.1
= control target key start
LH: loop header
LB: loop body
LE: loop exit
PB: predicated region body
PF: predicated region fallthrough
CT: control target
= control target key end

     0   :  { %s515_s22 = smov 16   ;;  %s712_s0 = inlined_call_operand.vmem [shape: bf16[64,16], index: 0, kind: input, shape index: {}]   ;;  %s713_s1 = inlined_call_operand.hbm [shape: bf16[64,144], index: 1, kind: output, shape index: {}]  }
   0x1   :  { %v538_v0 = vld [vmem:[%s712_s0 + $0x10] sm:$0xf]  ;;  %v543_v1 = vld [vmem:[%s712_s0 + $0x14] sm:$0xf]  ;;  %v550_v4 = vld [vmem:[%s712_s0] sm:$0xf] }
   0x2   :  { %v29_v2 = vmul.bf16 1073758208, %v538_v0  ;;  %v30_v3 = vmul.bf16 1073758208, %v543_v1  ;;  %v555_v5 = vld [vmem:[%s712_s0 + $0x4] sm:$0xf]  ;;  %v445_v6 = vcombine.low %v538_v0, %v543_v1  ;;  %v25_v7 = vmul.bf16 1073758208, %v550_v4 }
   0x3   :  { %v26_v8 = vmul.bf16 1073758208, %v555_v5  ;;  %v564_v9 = vld [vmem:[%s712_s0 + $0x18] sm:$0xf]  ;;  %v569_v10 = vld [vmem:[%s712_s0 + $0x1c] sm:$0xf]  ;;  %v443_v11 = vcombine.low %v550_v4, %v555_v5 }
   0x4   :  { %v449_v12 = vcombine.low %v29_v2, %v30_v3  ;;  %v31_v13 = vmul.bf16 1073758208, %v564_v9  ;;  %v32_v14 = vmul.bf16 1073758208, %v569_v10  ;;  %v578_v15 = vld [vmem:[%s712_s0 + $0x8] sm:$0xf]  ;;  %v583_v16 = vld [vmem:[%s712_s0 + $0xc] sm:$0xf]  ;;  %v446_v17 = vcombine.low %v564_v9, %v569_v10 }
   0x5   :  { %v447_v18 = vcombine.low %v25_v7, %v26_v8  ;;  %v27_v19 = vmul.bf16 1073758208, %v578_v15  ;;  %v28_v20 = vmul.bf16 1073758208, %v583_v16  ;;  %v35_v22 = vmul.bf16 1077952576, %v578_v15  ;;  %s516_s0 = smov 32  }
   0x6   :  { %133 = vrot.lane.b32.xlu1 %v449_v12, %s515_s22  ;;  %v450_v21 = vcombine.low %v31_v13, %v32_v14  ;;  %v36_v23 = vmul.bf16 1077952576, %v583_v16  ;;  %v33_v25 = vmul.bf16 1077952576, %v550_v4  ;;  %v34_v26 = vmul.bf16 1077952576, %v555_v5 }
   0x7   :  { %129 = vrot.lane.b32.xlu0 %v447_v18, %s515_s22  ;;  %v448_v24 = vcombine.low %v27_v19, %v28_v20  ;;  %v39_v28 = vmul.bf16 1077952576, %v564_v9  ;;  %v40_v29 = vmul.bf16 1077952576, %v569_v10  ;;  %v37_v31 = vmul.bf16 1077952576, %v538_v0 }
   0x8   :  { %v452_v27 = vcombine.low %v35_v22, %v36_v23  ;;  %v451_v30 = vcombine.low %v33_v25, %v34_v26  ;;  %v38_v32 = vmul.bf16 1077952576, %v543_v1  ;;  %v43_v34 = vmul.bf16 1082146944, %v578_v15 }
   0x9   :  { %v454_v33 = vcombine.low %v39_v28, %v40_v29  ;;  %v44_v35 = vmul.bf16 1082146944, %v583_v16 }
   0xa   :  { %135 = vrot.lane.b32.xlu1 %v450_v21, %s515_s22 }
   0xb   :  { %131 = vrot.lane.b32.xlu0 %v448_v24, %s515_s22 }
   0xe   :  { %159 = vrot.lane.b32.xlu1 %v452_v27, %s516_s0 }
   0xf   :  { %6 = vsyncpa [#allocation3], 0  ;;  %157 = vrot.lane.b32.xlu0 %v451_v30, %s516_s0  ;;  %v453_v36 = vcombine.low %v37_v31, %v38_v32  ;;  %v41_v37 = vmul.bf16 1082146944, %v550_v4  ;;  %v42_v38 = vmul.bf16 1082146944, %v555_v5  ;;  %v456_v39 = vcombine.low %v43_v34, %v44_v35 }
  0x10   :  { %v47_v40 = vmul.bf16 1082146944, %v564_v9  ;;  %v48_v41 = vmul.bf16 1082146944, %v569_v10  ;;  %v45_v43 = vmul.bf16 1082146944, %v538_v0  ;;  %v444_v51 = vcombine.low %v578_v15, %v583_v16 }
  0x11   :  { %v455_v42 = vcombine.low %v41_v37, %v42_v38  ;;  %v46_v44 = vmul.bf16 1082146944, %v543_v1  ;;  %s517_s23 = smov 48   ;;  %v51_v46 = vmul.bf16 1084244128, %v578_v15  ;;  %s518_s24 = smov 64  }
  0x12   :  { %163 = vrot.lane.b32.xlu1 %v454_v33, %s516_s0  ;;  %v458_v45 = vcombine.low %v47_v40, %v48_v41  ;;  %v52_v47 = vmul.bf16 1084244128, %v583_v16  ;;  %v49_v49 = vmul.bf16 1084244128, %v550_v4  ;;  %v50_v50 = vmul.bf16 1084244128, %v555_v5 }
  0x13   :  { %161 = vrot.lane.b32.xlu0 %v453_v36, %s516_s0  ;;  %v457_v48 = vcombine.low %v45_v43, %v46_v44  ;;  %v55_v53 = vmul.bf16 1084244128, %v564_v9  ;;  %v56_v54 = vmul.bf16 1084244128, %v569_v10  ;;  %v53_v56 = vmul.bf16 1084244128, %v538_v0 }
  0x14   :  { %v460_v52 = vcombine.low %v51_v46, %v52_v47  ;;  %v459_v55 = vcombine.low %v49_v49, %v50_v50  ;;  %v54_v57 = vmul.bf16 1084244128, %v543_v1  ;;  %v59_v59 = vmul.bf16 1086341312, %v578_v15  ;;  %s519_s25 = smov 80   ;;  %s520_s26 = smov 96  }
  0x15   :  { %v462_v58 = vcombine.low %v55_v53, %v56_v54  ;;  %v60_v60 = vmul.bf16 1086341312, %v583_v16  ;;  %v57_v62 = vmul.bf16 1086341312, %v550_v4  ;;  %v58_v63 = vmul.bf16 1086341312, %v555_v5 }
  0x16   :  { %187 = vrot.lane.b32.xlu1 %v456_v39, %s517_s23  ;;  %v461_v61 = vcombine.low %v53_v56, %v54_v57  ;;  %v63_v3 = vmul.bf16 1086341312, %v564_v9  ;;  %v64_v7 = vmul.bf16 1086341312, %v569_v10  ;;  %v61_v12 = vmul.bf16 1086341312, %v538_v0 }
  0x17   :  { %185 = vrot.lane.b32.xlu0 %v455_v42, %s517_s23  ;;  %v464_v2 = vcombine.low %v59_v59, %v60_v60  ;;  %v463_v8 = vcombine.low %v57_v62, %v58_v63  ;;  %v62_v13 = vmul.bf16 1086341312, %v543_v1  ;;  %v67_v18 = vmul.bf16 1088438496, %v578_v15  ;;  %s521_s27 = smov 112   ;;  %s522_s28 = smov [#allocation2]  }
  0x18   :  { %v466_v14 = vcombine.low %v63_v3, %v64_v7  ;;  %v68_v19 = vmul.bf16 1088438496, %v583_v16  ;;  %v65_v21 = vmul.bf16 1088438496, %v550_v4  ;;  %v66_v22 = vmul.bf16 1088438496, %v555_v5 }
  0x19   :  { %v465_v20 = vcombine.low %v61_v12, %v62_v13  ;;  %v71_v24 = vmul.bf16 1088438496, %v564_v9  ;;  %v72_v25 = vmul.bf16 1088438496, %v569_v10  ;;  %v69_v27 = vmul.bf16 1088438496, %v538_v0 }
  0x1a   :  { %191 = vrot.lane.b32.xlu1 %v458_v45, %s517_s23  ;;  %v468_v23 = vcombine.low %v67_v18, %v68_v19  ;;  %v467_v26 = vcombine.low %v65_v21, %v66_v22  ;;  %v70_v28 = vmul.bf16 1088438496, %v543_v1  ;;  %v75_v30 = vmul.bf16 1090535680, %v578_v15  ;;  %s432_s29 = sshll.u32 %s522_s28, 4  ;;  %s433_s29 = int_to_ptr.vmem [resolvable:$true] %s432_s29 }
  0x1b   :  { %189 = vrot.lane.b32.xlu0 %v457_v48, %s517_s23  ;;  %v470_v29 = vcombine.low %v71_v24, %v72_v25  ;;  %v76_v31 = vmul.bf16 1090535680, %v583_v16  ;;  %v73_v33 = vmul.bf16 1090535680, %v550_v4  ;;  %v74_v34 = vmul.bf16 1090535680, %v555_v5  ;;  %p498_p1 = scmp.lt.s32.totalorder %s433_s29, %s433_s29 }
  0x1c   :  { %v469_v32 = vcombine.low %v69_v27, %v70_v28  ;;  %v79_v36 = vmul.bf16 1090535680, %v564_v9  ;;  %v80_v37 = vmul.bf16 1090535680, %v569_v10  ;;  %v77_v39 = vmul.bf16 1090535680, %v538_v0 }
  0x1d   :  { %v472_v35 = vcombine.low %v75_v30, %v76_v31  ;;  %v471_v38 = vcombine.low %v73_v33, %v74_v34  ;;  %v78_v40 = vmul.bf16 1090535680, %v543_v1  ;;  %v82_v7 = vmul.bf16 1091584272, %v555_v5  ;;  %s493_s30 = scalar_lea.vmem %s433_s29, 1024 }
  0x1e   :  { %215 = vrot.lane.b32.xlu1 %v460_v52, %s518_s24  ;;  %v474_v41 = vcombine.low %v79_v36, %v80_v37  ;;  %vm321_vm0 = vcmask 130048   ;;  %vm334_vm1 = vcmask 261120   ;;  %vm343_vm2 = vcmask 392192   ;;  %p494_p0 = scmp.ne.s32.totalorder %s433_s29, %s493_s30  ;;  %p499_p2 = scmp.lt.s32.totalorder %s493_s30, %s493_s30 }
  0x1f   :  { %213 = vrot.lane.b32.xlu0 %v459_v55, %s518_s24  ;;  %v473_v42 = vcombine.low %v77_v39, %v78_v40  ;;  %vm352_vm3 = vcmask 523264   ;;  %vm361_vm4 = vcmask 654336   ;;  %vm370_vm5 = vcmask 785408  }
  0x20   :  { %v83_v12 = vmul.bf16 1091584272, %v578_v15  ;;  %vm379_vm6 = vcmask 916480   ;;  %vm416_vm7 = vcmask 1043456   ;;  %vm417_vm8 = vcmask 130052   ;;  %p500_p3 = por %p499_p2, %p498_p1 }
  0x21   :  { %v81_v21 = vmul.bf16 1091584272, %v550_v4  ;;  %v314_v22 = vunpack.c.l.b16 %v82_v7  ;;  %v88_v24 = vmul.bf16 1091584272, %v569_v10  ;;  %vm679_vm9 = vmor %vm417_vm8, %vm416_vm7 }
  0x22   :  { %219 = vrot.lane.b32.xlu1 %v462_v58, %s518_s24  ;;  %p501_p4 = pnand %p500_p3, %p494_p0 }
  0x23   :  { %217 = vrot.lane.b32.xlu0 %v461_v61, %s518_s24 }
  0x26   :  { %243 = vrot.lane.b32.xlu1 %v464_v2, %s519_s25  ;;  %v84_v2 = vmul.bf16 1091584272, %v583_v16 }
  0x27   :  { %241 = vrot.lane.b32.xlu0 %v463_v8, %s519_s25 }
  0x2a   :  { %247 = vrot.lane.b32.xlu1 %v466_v14, %s519_s25  ;;  %v316_v14 = vunpack.c.l.b16 %v84_v2 }
  0x2b   :  { %245 = vrot.lane.b32.xlu0 %v465_v20, %s519_s25 }
  0x2e   :  { %271 = vrot.lane.b32.xlu1 %v468_v23, %s520_s26 }
  0x2f   :  { %269 = vrot.lane.b32.xlu0 %v467_v26, %s520_s26  ;;  %v86_v26 = vmul.bf16 1091584272, %v543_v1 }
  0x32   :  { %275 = vrot.lane.b32.xlu1 %v470_v29, %s520_s26 }
  0x33   :  { %273 = vrot.lane.b32.xlu0 %v469_v32, %s520_s26 }
  0x36   :  { %299 = vrot.lane.b32.xlu1 %v472_v35, %s521_s27 }
  0x37   :  { %297 = vrot.lane.b32.xlu0 %v471_v38, %s521_s27 }
  0x3a   :  { %303 = vrot.lane.b32.xlu1 %v474_v41, %s521_s27 }
  0x3b   :  { %301 = vrot.lane.b32.xlu0 %v473_v42, %s521_s27 }
  0x78   :  { %v134_v43 = vpop.permute.xlu1 %133 }
  0x79   :  { %v130_v44 = vpop.permute.xlu0 %129  ;;  %v330_v4 = vsel %vm321_vm0, %v445_v6, %v134_v43 }
  0x7a   :  { %v324_v18 = vsel %vm321_vm0, %v443_v11, %v130_v44  ;;  %v85_v11 = vmul.bf16 1091584272, %v538_v0 }
  0x7c   :  { %v136_v45 = vpop.permute.xlu1 %135 }
  0x7d   :  { %v132_v46 = vpop.permute.xlu0 %131  ;;  %v333_v27 = vsel %vm321_vm0, %v446_v17, %v136_v45 }
  0x7e   :  { %v327_v13 = vsel %vm321_vm0, %v444_v51, %v132_v46  ;;  %v87_v51 = vmul.bf16 1091584272, %v564_v9  ;;  %v320_v46 = vunpack.c.l.b16 %v88_v24 }
  0x80   :  { %v160_v47 = vpop.permute.xlu1 %159 }
  0x81   :  { %v158_v48 = vpop.permute.xlu0 %157  ;;  %v338_v19 = vsel %vm334_vm1, %v327_v13, %v160_v47 }
  0x82   :  { %v336_v23 = vsel %vm334_vm1, %v324_v18, %v158_v48 }
  0x84   :  { %v164_v49 = vpop.permute.xlu1 %163 }
  0x85   :  { %v162_v50 = vpop.permute.xlu0 %161  ;;  %v342_v30 = vsel %vm334_vm1, %v333_v27, %v164_v49 }
  0x86   :  { %v340_v31 = vsel %vm334_vm1, %v330_v4, %v162_v50 }
  0x88   :  { %v188_v52 = vpop.permute.xlu1 %187 }
  0x89   :  { %v186_v53 = vpop.permute.xlu0 %185  ;;  %v347_v15 = vsel %vm343_vm2, %v338_v19, %v188_v52  ;;  %v318_v52 = vunpack.c.l.b16 %v86_v26 }
  0x8a   :  { %v345_v25 = vsel %vm343_vm2, %v336_v23, %v186_v53 }
  0x8c   :  { %v192_v54 = vpop.permute.xlu1 %191 }
  0x8d   :  { %v190_v55 = vpop.permute.xlu0 %189  ;;  %v351_v1 = vsel %vm343_vm2, %v342_v30, %v192_v54 }
  0x8e   :  { %v349_v6 = vsel %vm343_vm2, %v340_v31, %v190_v55 }
  0x90   :  { %v216_v56 = vpop.permute.xlu1 %215 }
  0x91   :  { %v214_v57 = vpop.permute.xlu0 %213  ;;  %v356_v5 = vsel %vm352_vm3, %v347_v15, %v216_v56 }
  0x92   :  { %v354_v28 = vsel %vm352_vm3, %v345_v25, %v214_v57 }
  0x94   :  { %v220_v58 = vpop.permute.xlu1 %219 }
  0x95   :  { %v218_v59 = vpop.permute.xlu0 %217  ;;  %v360_v35 = vsel %vm352_vm3, %v351_v1, %v220_v58 }
  0x96   :  { %v358_v39 = vsel %vm352_vm3, %v349_v6, %v218_v59 }
  0x98   :  { %v244_v60 = vpop.permute.xlu1 %243 }
  0x99   :  { %v242_v61 = vpop.permute.xlu0 %241  ;;  %v365_v29 = vsel %vm361_vm4, %v356_v5, %v244_v60 }
  0x9a   :  { %v363_v32 = vsel %vm361_vm4, %v354_v28, %v242_v61 }
  0x9c   :  { %v248_v62 = vpop.permute.xlu1 %247 }
  0x9d   :  { %v246_v63 = vpop.permute.xlu0 %245  ;;  %v369_v40 = vsel %vm361_vm4, %v360_v35, %v248_v62 }
  0x9e   :  { %v367_v43 = vsel %vm361_vm4, %v358_v39, %v246_v63 }
  0xa0   :  { %v272_v3 = vpop.permute.xlu1 %271 }
  0xa1   :  { %v270_v8 = vpop.permute.xlu0 %269  ;;  %v374_v33 = vsel %vm370_vm5, %v365_v29, %v272_v3 }
  0xa2   :  { %v372_v9 = vsel %vm370_vm5, %v363_v32, %v270_v8 }
  0xa4   :  { %v276_v20 = vpop.permute.xlu1 %275 }
  0xa5   :  { %v274_v16 = vpop.permute.xlu0 %273  ;;  %v378_v44 = vsel %vm370_vm5, %v369_v40, %v276_v20 }
  0xa6   :  { %v376_v48 = vsel %vm370_vm5, %v367_v43, %v274_v16 }
  0xa8   :  { %v300_v0 = vpop.permute.xlu1 %299 }
  0xa9   :  { %v383_v17 = vsel %vm379_vm6, %v374_v33, %v300_v0  ;;  %v298_v34 = vpop.permute.xlu0 %297 }
  0xaa   :  { %v395_v36 = vunpack.c.h.b16 %v383_v17  ;;  %v476_v37 = vcombine.low %v383_v17, %v83_v12  ;;  %v381_v38 = vsel %vm379_vm6, %v372_v9, %v298_v34 }
  0xab   :  { %v393_v41 = vunpack.c.h.b16 %v381_v38  ;;  %v475_v42 = vcombine.low %v381_v38, %v81_v21 }
  0xac   :  { %v403_v45 = vpack.c.b16 %v316_v14, %v395_v36  ;;  %421 = vst.msk [vmem:[#allocation2 + $0x10] sm:$0xff] %vm679_vm9, %v476_v37  ;;  %v304_v47 = vpop.permute.xlu1 %303 }
  0xad   :  { %v401_v49 = vpack.c.b16 %v314_v22, %v393_v41  ;;  %419 = vst.msk [vmem:[#allocation2] sm:$0xff] %vm679_vm9, %v475_v42  ;;  %v387_v50 = vsel %vm379_vm6, %v378_v44, %v304_v47  ;;  %v302_v53 = vpop.permute.xlu0 %301 }
  0xae   :  { %422 = vst.msk [vmem:[#allocation2 + $0x18] sm:$0xff] %vm679_vm9, %v403_v45  ;;  %v399_v54 = vunpack.c.h.b16 %v387_v50  ;;  %v478_v55 = vcombine.low %v387_v50, %v87_v51  ;;  %v385_v56 = vsel %vm379_vm6, %v376_v48, %v302_v53 }
  0xaf   :  { %420 = vst.msk [vmem:[#allocation2 + $0x8] sm:$0xff] %vm679_vm9, %v401_v49  ;;  %v397_v57 = vunpack.c.h.b16 %v385_v56  ;;  %v477_v58 = vcombine.low %v385_v56, %v85_v11 }
  0xb0   :  { %v407_v59 = vpack.c.b16 %v320_v46, %v399_v54  ;;  %425 = vst.msk [vmem:[#allocation2 + $0x30] sm:$0xff] %vm679_vm9, %v478_v55 }
  0xb1   :  { %v405_v60 = vpack.c.b16 %v318_v52, %v397_v57  ;;  %423 = vst.msk [vmem:[#allocation2 + $0x20] sm:$0xff] %vm679_vm9, %v477_v58 }
  0xb2   :  { %426 = vst.msk [vmem:[#allocation2 + $0x38] sm:$0xff] %vm679_vm9, %v407_v59 }
  0xb3   :  { %424 = vst.msk [vmem:[#allocation2 + $0x28] sm:$0xff] %vm679_vm9, %v405_v60 }
  0xb4   :  { %504 = shalt.err (!%p501_p4)
}
  0xb5   :  { %s523_s2 = smov 128   ;;  %s524_s3 = smov 8  }
  0xb6   :  { %438 = dma.vmem_to_hbm [thread:$0]  %s433_s29, 1024, %s713_s1, [#allocation3], %s523_s2, %s523_s2, %s524_s3  }
  0xb7   :  { %513 = dma.done.wait [#allocation3], 1024  }
  0xb8   :  { %514 = vsyncadd [#allocation3], 4294966272 }
  0xb9   :  { %442 = vsyncpa [#allocation3], 1 }

// kernel: tpu_custom_call.1
= control target key start
LH: loop header
LB: loop body
LE: loop exit
PB: predicated region body
PF: predicated region fallthrough
CT: control target
= control target key end

     0   :  { %10 = vsyncpa [#allocation4], 0  ;;  %s1803_s0 = inlined_call_operand.vmem [shape: bf16[2,2,4,16], index: 0, kind: input, shape index: {}]   ;;  %s1804_s1 = inlined_call_operand.vmem [shape: bf16[144,16], index: 1, kind: input, shape index: {}]   ;;  %s1805_s2 = inlined_call_operand.vmem [shape: bf16[4,9], index: 2, kind: input, shape index: {}]   ;;  %s1806_s3 = inlined_call_operand.hbm [shape: bf16[2,2,4,16], index: 3, kind: output, shape index: {0}]   ;;  %s1807_s4 = inlined_call_operand.hbm [shape: f32[2,2,2,16], index: 4, kind: output, shape index: {1}]  }
   0x1   :  { %12 = vsyncpa [#allocation4 + $0x1], 0 }
   0x2   :  { %13 = vsyncpa [#allocation6], 0 }
   0x3   :  { %15 = vsyncpa [#allocation6 + $0x1], 0  ;;  %s1538_s15 = smov 0   ;;  %s1540_s16 = smov 0  }
   0x4   :  { %s1542_s17 = smov 0   ;;  %s1544_s18 = smov 0  }
   0x5   :  { %s1546_s19 = smov 0   ;;  %s1548_s20 = smov 0  }
   0x6   :  { %s1550_s21 = smov 0   ;;  %s1552_s22 = smov 0  }
   0x7 LB: > { %s1159_s23 = sadd.s32 4294967295, %s1499_s22   ;;  %s1160_s24 = sadd.s32 4294967294, %s1499_s22   ;;  %s1499_s22 = sphi %s1552_s22, %s21_s22   ;;  %s1495_s21 = sphi %s1550_s21, %s1818_s21   ;;  %s1491_s20 = sphi %s1548_s20, %s1817_s20   ;;  %s1487_s19 = sphi %s1546_s19, %s1816_s19   ;;  %s1483_s18 = sphi %s1544_s18, %s1815_s18   ;;  %s1479_s17 = sphi %s1542_s17, %s1814_s17   ;;  %s1475_s16 = sphi %s1540_s16, %s1813_s16   ;;  %s1471_s15 = sphi %s1538_s15, %s1812_s15  }
   0x8   : > { %s30_s25 = sadd.s32 1, %s1491_s20  ;;  %s33_s26 = sadd.s32 1, %s1495_s21 }
   0x9   : > { %p31_p0 = scmp.ge.s32.totalorder %s30_s25, 2  ;;  %p122_p1 = scmp.ne.s32.totalorder %s1479_s17, %s1475_s16 }
   0xa   : > { %p123_p2 = scmp.eq.s32.totalorder %s1159_s23, 3  ;;  %p128_p5 = scmp.ne.s32.totalorder %s1475_s16, %s1471_s15 }
   0xb   : > { %s1820_s25 = smov (%p31_p0, %s30_s25), 0  ;;  %s1822_s26 = smov (!%p31_p0, %s33_s26), %s1495_s21 }
   0xc   : > { %s108_s27 = ssub.s32 %s1491_s20, %s1820_s25  ;;  %p1589_p3 = por %p123_p2, %p122_p1 }
   0xd   : > { %p35_p4 = scmp.ge.s32.totalorder %s1822_s26, 2  ;;  %p129_p6 = scmp.eq.s32.totalorder %s1160_s24, 3 }
   0xe   : > { %p1163_p7 = scmp.ge.s32.totalorder %s1499_s22, 1  ;;  %p192_p9 = scmp.lt.s32.totalorder %s1499_s22, 5 }
   0xf   : > { %s1824_s26 = smov (%p35_p4, %s1822_s26), 0  ;;  %p1598_p8 = por %p129_p6, %p128_p5 }
  0x10   : > { %s107_s30 = ssub.s32 %s1495_s21, %s1824_s26  ;;  %s112_s5 = sadd.s32 1, %s1479_s17 }
  0x11   : > { %s109_s6 = sor.u32 %s108_s27, %s107_s30  ;;  %p193_p10 = pnand %p1163_p7, %p192_p9 }
  0x12   : > { %p110_p11 = scmp.eq.s32.totalorder %s109_s6, 0  ;;  %p226_p12 = scmp.lt.s32.totalorder (!%p193_p10), %s1487_s19, 1 }
  0x13   : > { %196 = sbr.rel (%p193_p10) target bundleno = 436 (0x1b4), region = 32  ;;  %p228_p13 = scmp.lt.s32.totalorder (!%p193_p10), %s1483_s18, 1 }
  0x14   : > { %s1607_s7 = scalar_select %p110_p11, %s1479_s17, %s112_s5  }
  0x15   : > { %s1196_s8 = sshll.u32 (!%p193_p10), %s1487_s19, 1  ;;  %s1511_s27 = smov (!%p193_p10), [#allocation3]  }
  0x16   : > { %s1711_s11 = sadd.s32 (!%p193_p10), %s1483_s18, %s1196_s8  ;;  %s1381_s30 = sshll.u32 (!%p193_p10), %s1511_s27, 4  ;;  %s1382_s30 = int_to_ptr.vmem [resolvable:$false] %s1381_s30 }
  0x17   : > { %s1808_s12 = sshll.u32 (!%p193_p10), %s1711_s11, 5 }
  0x18   : > { %vm238_vm0 = vcmask 123904   ;;  %vm235_vm1 = vcmask 125952   ;;  %v1501_v0 = vmov 0   ;;  %v262_v1 = vld [vmem:[%s1805_s2] sm:$0x3]  ;;  %s227_s10 = scalar_select %p226_p12, %s1487_s19, 1  ;;  %v271_v23 = vlaneseq }
  0x19   : > { %1360 = vset.pattern.permute.xlu0 %v1501_v0  ;;  %236 = vst.msk [vmem:[#allocation2] sm:$0xf] %vm235_vm1, %v1501_v0  ;;  %237 = vst.msk [vmem:[#allocation2 + $0x4] sm:$0xf] %vm235_vm1, %v1501_v0  ;;  %v1502_v2 = vmov 3   ;;  %s229_s13 = scalar_select %p228_p13, %s1483_s18, 1 }
  0x1a   : > { %265 = vperm.xlu0 %1360, %v262_v1   ;;  %1362 = vset.pattern.permute.xlu1 %v1502_v2  ;;  %v333_v3 = vld [vmem:[%s1805_s2] sm:$0x3]  ;;  %s1166_s14 = sshll.u32 %s227_s10, 1  ;;  %v1503_v6 = vmov 2   ;;  %v1366_v7 = vld [vmem:[%s1804_s1 + $0x8] sm:$0xff]   ;;  %v1504_v8 = vmov 5   ;;  %s1722_s24 = scalar_lea.hbm %s1806_s3, %s1808_s12 }
  0x1b   : > { %336 = vperm.xlu1 %1362, %v333_v3   ;;  %v299_v4 = vld [vmem:[%s1805_s2] sm:$0x3]  ;;  %s231_s5 = sadd.s32 %s1166_s14, %s229_s13  ;;  %v1505_v11 = vmov 0.0   ;;  %vm1506_vm2 = vmmov 0   ;;  %v1507_v13 = vmov 8   ;;  %v1508_v14 = vmov 6  }
  0x1c   : > { %v369_v5 = vld [vmem:[%s1805_s2] sm:$0x3]  ;;  %s1167_s6 = sshll.u32 %s231_s5, 1  ;;  %1220 = vmatprep.subr.bf16.mxu0 %v1505_v11  ;;  %1226 = vmatprep.subr.bf16.mxu1 %v1505_v11  ;;  %vm474_vm3 = vcmask 130048   ;;  %v1369_v20 = vld [vmem:[%s1804_s1 + $0x10] sm:$0xff]   ;;  %v272_v27 = vshrl.u32 %v271_v23, 7 }
  0x1d   : > { %s233_s10 = scalar_lea.vmem %s1803_s0, %s1167_s6  ;;  %v431_v10 = vld [vmem:[%s1805_s2] sm:$0x3]  ;;  %1221 = vmatpush3.bf16.msra.mxu0 %v1366_v7  ;;  %1222 = vmatprep.mubr.msk.bf16.mxu0 %vm1506_vm2, %v1505_v11  ;;  %v1509_v21 = vmov 269488144   ;;  %v1510_v24 = vmov 1983009808  }
  0x1e   : > { %1361 = vset.pattern.permute.xlu0 %v1503_v6  ;;  %v240_v9 = vld [vmem:[%s233_s10] sm:$0x3]  ;;  %1232 = vmatprep.subr.bf16.mxu0 %v1505_v11  ;;  %v269_v22 = vunpack.c.l.s4 %v1509_v21  ;;  %v277_v25 = vunpack.c.l.s4 %v1510_v24  ;;  %s1706_s6 = sand.u32 1, %s1475_s16   ;;  %s1383_s5 = scalar_lea.vmem %s1382_s30, 64 }
  0x1f   : > { %302 = vperm.xlu0 %1361, %v299_v4   ;;  %1363 = vset.pattern.permute.xlu1 %v1504_v8  ;;  %259 = vst.msk [vmem:[#allocation2 + $0x4] sm:$0x3] %vm238_vm0, %v240_v9  ;;  %v399_v12 = vld [vmem:[%s1805_s2] sm:$0x3]  ;;  %s1164_s9 = sshll.u32 %s1706_s6, 1  ;;  %s1012_s13 = scalar_lea.sflag [#allocation4], %s1706_s6 }
  0x20   : > { %372 = vperm.xlu1 %1363, %v369_v5   ;;  %1228 = vmatprep.mubr.msk.bf16.mxu1 %vm1506_vm2, %v1505_v11  ;;  %v1368_v15 = vld [vmem:[%s1804_s1] sm:$0xff]   ;;  %v270_v26 = vunpack.c.0.s8 %v269_v22  ;;  %v278_v28 = vunpack.c.0.s8 %v277_v25  ;;  %s218_s10 = scalar_lea.vmem [#allocation3], %s1164_s9 }
  0x21   : > { %v1650_v16 = vld [vmem:[#allocation2] sm:$0x8]  ;;  %1227 = vmatpush3.bf16.msra.mxu1 %v1368_v15  ;;  %s1032_s23 = sshll.u32 %s218_s10, 4  ;;  %s1724_s23 = int_to_ptr.vmem [resolvable:$true] %s1032_s23 }
  0x22   : > { %1238 = vmatprep.subr.bf16.mxu1 %v1505_v11  ;;  %v273_v29 = vsub.s32 %v270_v26, %v272_v27  ;;  %v281_v30 = vsub.s32 %v278_v28, %v272_v27  ;;  %v260_v47 = vld [vmem:[#allocation2] sm:$0xc]  ;;  %s1377_s14 = scalar_lea.vmem %s1724_s23, 32  ;;  %p1384_p4 = scmp.lt.s32.totalorder %s1724_s23, %s1382_s30 }
  0x23   : > { %1365 = vset.pattern.permute.xlu0 %v1507_v13  ;;  %p1378_p0 = scmp.ne.s32.totalorder %s1724_s23, %s1377_s14  ;;  %p1385_p5 = scmp.lt.s32.totalorder %s1383_s5, %s1377_s14 }
  0x24   : > { %1364 = vset.pattern.permute.xlu1 %v1508_v14  ;;  %434 = vperm.xlu0 %1365, %v431_v10  }
  0x25   : > { %402 = vperm.xlu1 %1364, %v399_v12   ;;  %p1379_p1 = pnand %p1378_p0, %p1589_p3  ;;  %p1386_p6 = por %p1385_p5, %p1384_p4 }
  0x26   : > { %v297_v17 = vld [vmem:[#allocation2 + $0x4] sm:$0x1] }
  0x27   : > { %v1168_v18 = vcombine.low %v1650_v16, %v297_v17  ;;  %v261_v48 = vld [vmem:[#allocation2 + $0x4] sm:$0x1]  ;;  %p1380_p2 = pneg %p1379_p1 }
  0x28   : > { %v298_v62 = vld [vmem:[#allocation2 + $0x4] sm:$0x3] }
  0x29   : > { %v467_v19 = vrot.slane %v1168_v18, 3  ;;  %p1387_p7 = pnand %p1386_p6, %p1380_p2 }
  0x2b   : > { %1223 = vmatmul.mubr.msk.bf16.vlgmr.msra.gmra.mxu0 %vm474_vm3, %v467_v19  ;;  %v368_v19 = vld [vmem:[#allocation2 + $0x4] sm:$0x7] }
  0x2c   : > { %1233 = vmatpush3.bf16.msra.mxu0 %v1369_v20  ;;  %1234 = vmatprep.mubr.msk.bf16.mxu0 %vm1506_vm2, %v1505_v11 }
  0x2d   : > { %1244 = vmatprep.subr.bf16.mxu0 %v1505_v11 }
  0x95   : > { %v266_v31 = vpop.permute.xlu0 %265 }
  0x96   : > { %v274_v32 = vrot.slane %v266_v31, %v273_v29  ;;  %v337_v33 = vpop.permute.xlu1 %336  ;;  %v1370_v31 = vld [vmem:[%s1804_s1 + $0x18] sm:$0xff]  }
  0x97   : > { %v345_v34 = vrot.slane %v337_v33, %v273_v29 }
  0x98   : > { %v282_v35 = vrot.slane %v274_v32, %v281_v30 }
  0x99   : > { %v353_v36 = vrot.slane %v345_v34, %v281_v30 }
  0x9a   : > { %v284_v37 = vshrl.u32 %v282_v35, 16  ;;  %v287_v38 = vshll.u32 %v282_v35, 16  ;;  %v303_v39 = vpop.permute.xlu0 %302 }
  0x9b   : > { %v311_v40 = vrot.slane %v303_v39, %v273_v29  ;;  %v355_v41 = vshll.u32 %v353_v36, 16  ;;  %v358_v42 = vshrl.u32 %v353_v36, 16  ;;  %v373_v43 = vpop.permute.xlu1 %372 }
  0x9c   : > { %v286_v44 = vrot.slane %v284_v37, 5  ;;  %v289_v45 = vrot.slane %v287_v38, 6  ;;  %v381_v46 = vrot.slane %v373_v43, %v273_v29 }
  0x9d   : > { %v319_v49 = vrot.slane %v311_v40, %v281_v30  ;;  %v357_v50 = vrot.slane %v355_v41, 5  ;;  %v360_v51 = vrot.slane %v358_v42, 4 }
  0x9e   : > { %v290_v52 = vor.u32 %v289_v45, %v286_v44  ;;  %v291_v53 = vrot.slane %v286_v44, 4  ;;  %v389_v54 = vrot.slane %v381_v46, %v281_v30  ;;  %v1371_v45 = vld [vmem:[%s1804_s1 + $0x20] sm:$0xff]  }
  0x9f   : > { %v321_v55 = vshll.u32 %v319_v49, 16  ;;  %v324_v56 = vshrl.u32 %v319_v49, 16  ;;  %v361_v57 = vor.u32 %v360_v51, %v357_v50  ;;  %v365_v58 = vmul.bf16 %v357_v50, %v1650_v16  ;;  %v435_v59 = vpop.permute.xlu0 %434  ;;  %v1372_v49 = vld [vmem:[%s1804_s1 + $0x28] sm:$0xff]  }
  0xa0   : > { %v294_v60 = vmul.bf16 %v290_v52, %v260_v47  ;;  %v295_v61 = vmul.bf16 %v291_v53, %v261_v48  ;;  %v391_v63 = vshrl.u32 %v389_v54, 16  ;;  %v394_v0 = vshll.u32 %v389_v54, 16  ;;  %v403_v1 = vpop.permute.xlu1 %402  ;;  %v430_v52 = vld [vmem:[#allocation2 + $0x4] sm:$0xe] }
  0xa1   : > { %v323_v2 = vrot.slane %v321_v55, 5  ;;  %v326_v3 = vrot.slane %v324_v56, 4  ;;  %v362_v4 = vrot.slane %v361_v57, 4  ;;  %v411_v5 = vrot.slane %v403_v1, %v273_v29  ;;  %v367_v57 = vld [vmem:[#allocation2 + $0x4] sm:$0x3] }
  0xa2   : > { %v1171_v6 = vcombine.low %v294_v60, %v295_v61  ;;  %v393_v7 = vrot.slane %v391_v63, 7  ;;  %v443_v8 = vrot.slane %v435_v59, %v273_v29  ;;  %v1374_v60 = vld [vmem:[%s1804_s1 + $0x38] sm:$0xff]   ;;  %v1376_v63 = vld [vmem:[#allocation2 + $0x4] ss:$0 sps:$4 sm:$0x66]  }
  0xa3   : > { %v327_v9 = vor.u32 %v326_v3, %v323_v2  ;;  %v366_v10 = vmul.bf16 %v362_v4, %v298_v62  ;;  %v419_v12 = vrot.slane %v411_v5, %v281_v30  ;;  %v331_v22 = vmul.bf16 %v323_v2, %v1650_v16  ;;  %v1375_v4 = vld [vmem:[%s1804_s1 + $0x40] sm:$0xff]  }
  0xa4   : > { %v396_v13 = vor.u32 %v394_v0, %v393_v7  ;;  %v524_v14 = vshrl.u32 %v1171_v6, 16  ;;  %v527_v15 = vshll.u32 %v1171_v6, 16  ;;  %v451_v21 = vrot.slane %v443_v8, %v281_v30 }
  0xa5   : > { %v328_v17 = vrot.slane %v327_v9, 4  ;;  %v1177_v18 = vcombine.low %v365_v58, %v366_v10  ;;  %v421_v20 = vshrl.u32 %v419_v12, 16  ;;  %v424_v23 = vshll.u32 %v419_v12, 16  ;;  %v1373_v58 = vld [vmem:[%s1804_s1 + $0x30] sm:$0xff]  }
  0xa6   : > { %v526_v24 = vrot.slane %v524_v14, 2  ;;  %v529_v25 = vrot.slane %v527_v15, 3  ;;  %v398_v32 = vmul.bf16 %v396_v13, %v368_v19  ;;  %v453_v35 = vshrl.u32 %v451_v21, 16 }
  0xa7   : > { %v332_v26 = vmul.bf16 %v328_v17, %v298_v62  ;;  %v649_v27 = vshrl.u32 %v1177_v18, 16  ;;  %v652_v28 = vshll.u32 %v1177_v18, 16  ;;  %v423_v29 = vrot.slane %v421_v20, 7 }
  0xa8   : > { %v530_v33 = vor.u32 %v529_v25, %v526_v24  ;;  %v456_v36 = vshll.u32 %v451_v21, 16  ;;  %v1182_v40 = vcombine.low %v398_v32, %v398_v32  ;;  %v455_v43 = vrot.slane %v453_v35, 6 }
  0xa9   : > { %v1174_v34 = vcombine.low %v331_v22, %v332_v26  ;;  %v651_v37 = vrot.slane %v649_v27, 3  ;;  %v654_v30 = vrot.slane %v652_v28, 4  ;;  %v426_v39 = vor.u32 %v424_v23, %v423_v29 }
  0xaa   : > { %1229 = vmatmul.mubr.msk.bf16.vlgmr.msra.gmra.mxu1 %vm474_vm3, %v530_v33  ;;  %v458_v44 = vrot.slane %v456_v36, 7  ;;  %v762_v50 = vshll.u32 %v1182_v40, 16  ;;  %v760_v54 = vshrl.u32 %v1182_v40, 16  ;;  %v879_v5 = vrot.slane %v1376_v63, 1 }
  0xab   : > { %v586_v16 = vshrl.u32 %v1174_v34, 16  ;;  %v589_v38 = vshll.u32 %v1174_v34, 16  ;;  %1239 = vmatpush3.bf16.msra.mxu1 %v1370_v31  ;;  %1240 = vmatprep.mubr.msk.bf16.mxu1 %vm1506_vm2, %v1505_v11  ;;  %v655_v46 = vor.u32 %v654_v30, %v651_v37  ;;  %v428_v47 = vmul.bf16 %v426_v39, %v368_v19 }
  0xac   : > { %1250 = vmatprep.subr.bf16.mxu1 %v1505_v11  ;;  %v459_v51 = vor.u32 %v458_v44, %v455_v43  ;;  %v764_v55 = vrot.slane %v762_v50, 1 }
  0xad   : > { %v588_v41 = vrot.slane %v586_v16, 3  ;;  %v591_v42 = vrot.slane %v589_v38, 4  ;;  %v1185_v53 = vcombine.low %v428_v47, %v428_v47 }
  0xae   : > { %v461_v56 = vmul.bf16 %v459_v51, %v430_v52  ;;  %v765_v61 = vor.u32 %v764_v55, %v760_v54 }
  0xaf   : > { %v592_v48 = vor.u32 %v591_v42, %v588_v41  ;;  %v822_v59 = vshll.u32 %v1185_v53, 16  ;;  %v820_v0 = vshrl.u32 %v1185_v53, 16 }
  0xb0   : > { %v1191_v62 = vcombine.low %v461_v56, %v461_v56 }
  0xb1   : > { %1235 = vmatmul.mubr.msk.bf16.vlgmr.msra.gmra.mxu0 %vm474_vm3, %v592_v48  ;;  %v824_v1 = vrot.slane %v822_v59, 1 }
  0xb2   : > { %1245 = vmatpush3.bf16.msra.mxu0 %v1371_v45  ;;  %1241 = vmatmul.mubr.msk.bf16.vlgmr.msra.gmra.mxu1 %vm474_vm3, %v655_v46  ;;  %v934_v2 = vshrl.u32 %v1191_v62, 16  ;;  %v937_v3 = vshll.u32 %v1191_v62, 16 }
  0xb3   : > { %1251 = vmatpush3.bf16.msra.mxu1 %v1372_v49  ;;  %1246 = vmatprep.mubr.msk.bf16.mxu0 %vm1506_vm2, %v1505_v11  ;;  %v825_v6 = vor.u32 %v824_v1, %v820_v0 }
  0xb4   : > { %1256 = vmatprep.subr.bf16.mxu0 %v1505_v11  ;;  %1252 = vmatprep.mubr.msk.bf16.mxu1 %vm1506_vm2, %v1505_v11  ;;  %v936_v7 = vrot.slane %v934_v2, 1  ;;  %v939_v8 = vrot.slane %v937_v3, 2 }
  0xb5   : > { %1262 = vmatprep.subr.bf16.mxu1 %v1505_v11 }
  0xb6   : > { %v940_v9 = vor.u32 %v939_v8, %v936_v7 }
  0xb9   : > { %1247 = vmatmul.mubr.msk.bf16.vlgmr.msra.gmra.mxu0 %vm474_vm3, %v367_v57 }
  0xba   : > { %1257 = vmatpush3.bf16.msra.mxu0 %v1373_v58  ;;  %1253 = vmatmul.mubr.msk.bf16.vlgmr.msra.gmra.mxu1 %vm474_vm3, %v765_v61 }
  0xbb   : > { %1263 = vmatpush3.bf16.msra.mxu1 %v1374_v60  ;;  %1258 = vmatprep.mubr.msk.bf16.mxu0 %vm1506_vm2, %v1505_v11 }
  0xbc   : > { %1268 = vmatprep.subr.bf16.mxu0 %v1505_v11  ;;  %1264 = vmatprep.mubr.msk.bf16.mxu1 %vm1506_vm2, %v1505_v11 }
  0xc1   : > { %1259 = vmatmul.mubr.msk.bf16.vlgmr.msra.gmra.mxu0 %vm474_vm3, %v825_v6 }
  0xc2   : > { %1269 = vmatpush3.bf16.msra.mxu0 %v1375_v4  ;;  %1265 = vmatmul.mubr.msk.bf16.vlgmr.msra.gmra.mxu1 %vm474_vm3, %v879_v5 }
  0xc3   : > { %1270 = vmatprep.mubr.msk.bf16.mxu0 %vm1506_vm2, %v1505_v11 }
  0xc9   : > { %1271 = vmatmul.mubr.msk.bf16.vlgmr.msra.gmra.mxu0 %vm474_vm3, %v940_v9 }
  0xeb   : > { %v512_v10 = vpop.f32.mrf.mxu0 }
  0xed   : > { %v1224_v12 = vpop.f32.mrf.mxu0 }
  0xef   : > { %v515_v13 = vpop.f32.mrf.mxu0 }
  0xf1   : > { %v1225_v14 = vpop.f32.mrf.mxu0 }
 0x16a   : > { %v574_v15 = vpop.f32.mrf.mxu1 }
 0x16b   : > { %v575_v25 = vadd.f32 %v574_v15, %v512_v10 }
 0x16c   : > { %v1230_v17 = vpop.f32.mrf.mxu1 }
 0x16e   : > { %v577_v18 = vpop.f32.mrf.mxu1 }
 0x170   : > { %v1231_v19 = vpop.f32.mrf.mxu1 }
 0x171   : > { %v636_v20 = vpop.f32.mrf.mxu0 }
 0x172   : > { %v699_v21 = vpop.f32.mrf.mxu1  ;;  %v642_v11 = vadd.f32 %v636_v20, %v575_v25 }
 0x173   : > { %v1236_v22 = vpop.f32.mrf.mxu0 }
 0x174   : > { %v1242_v23 = vpop.f32.mrf.mxu1  ;;  %v705_v33 = vadd.f32 %v699_v21, %v642_v11 }
 0x175   : > { %v639_v24 = vpop.f32.mrf.mxu0 }
 0x176   : > { %v702_v26 = vpop.f32.mrf.mxu1 }
 0x177   : > { %v1237_v27 = vpop.f32.mrf.mxu0 }
 0x178   : > { %v1243_v28 = vpop.f32.mrf.mxu1 }
 0x179   : > { %v749_v29 = vpop.f32.mrf.mxu0 }
 0x17a   : > { %v809_v31 = vpop.f32.mrf.mxu1  ;;  %v755_v36 = vadd.f32 %v749_v29, %v705_v33 }
 0x17b   : > { %v1248_v32 = vpop.f32.mrf.mxu0 }
 0x17c   : > { %v1254_v34 = vpop.f32.mrf.mxu1  ;;  %v815_v39 = vadd.f32 %v809_v31, %v755_v36 }
 0x17d   : > { %v752_v35 = vpop.f32.mrf.mxu0 }
 0x17e   : > { %v812_v37 = vpop.f32.mrf.mxu1 }
 0x17f   : > { %v1249_v30 = vpop.f32.mrf.mxu0 }
 0x180   : > { %v1255_v16 = vpop.f32.mrf.mxu1 }
 0x181   : > { %v869_v38 = vpop.f32.mrf.mxu0 }
 0x182   : > { %v923_v40 = vpop.f32.mrf.mxu1  ;;  %v875_v42 = vadd.f32 %v869_v38, %v815_v39 }
 0x183   : > { %v1260_v41 = vpop.f32.mrf.mxu0 }
 0x184   : > { %v1266_v43 = vpop.f32.mrf.mxu1  ;;  %v929_v47 = vadd.f32 %v923_v40, %v875_v42 }
 0x185   : > { %v872_v44 = vpop.f32.mrf.mxu0 }
 0x186   : > { %v926_v45 = vpop.f32.mrf.mxu1 }
 0x187   : > { %v1261_v46 = vpop.f32.mrf.mxu0 }
 0x188   : > { %v1267_v48 = vpop.f32.mrf.mxu1 }
 0x189   : > { %v984_v49 = vpop.f32.mrf.mxu0 }
 0x18a   : > { %v990_v50 = vadd.f32 %v984_v49, %v929_v47 }
 0x18b   : > { %v1272_v51 = vpop.f32.mrf.mxu0 }
 0x18c   : > { %v991_v52 = vsel %vm235_vm1, %v990_v50, 0.0  ;;  %v1000_v53 = vmul.f32 %v990_v50, %v990_v50  ;;  %v1009_v54 = vpack.c.bf16 %v990_v50, %v990_v50 }
 0x18d   : > { %v992_v55 = vrot.slane %v991_v52, 4  ;;  %v987_v56 = vpop.f32.mrf.mxu0 }
 0x18e   : > { %v1001_v57 = vsel %vm235_vm1, %v1000_v53, 0.0  ;;  %1010 = vst.msk [vmem:[%s218_s10] sm:$0x3] %vm238_vm0, %v1009_v54 }
 0x18f   : > { %v993_v58 = vadd.f32 %v992_v55, %v991_v52  ;;  %v1002_v59 = vrot.slane %v1001_v57, 4  ;;  %v1273_v60 = vpop.f32.mrf.mxu0 }
 0x190   : > { %1390 = shalt.err (!%p1387_p7)
}
 0x191   : > { %s1391_s8 = scalar_lea.hbm %s1722_s24, 32  ;;  %s1395_s19 = scalar_lea.hbm %s1806_s3, 128 }
 0x192   : > { %p1392_p9 = scmp.ne.s32.totalorder %s1722_s24, %s1391_s8  ;;  %p1396_p12 = scmp.lt.s32.totalorder %s1722_s24, %s1806_s3 }
 0x193   : > { %p1397_p13 = scmp.lt.s32.totalorder %s1395_s19, %s1391_s8 }
 0x194   : > { %p1393_p10 = pnand %p1392_p9, %p1589_p3 }
 0x195   : > { %p1398_p0 = por %p1397_p13, %p1396_p12 }
 0x196   : > { %p1394_p11 = pneg %p1393_p10 }
 0x198   : > { %p1399_p1 = pnand %p1398_p0, %p1394_p11 }
 0x19a   : > { %1402 = shalt.err (!%p1399_p1)
}
 0x19b   : > { %1274 = dma.vmem_to_hbm [thread:$0]  (%p1589_p3), %s1724_s23, 32, %s1722_s24, %s1012_s13   ;;  %v994_v61 = vrot.slane %v993_v58, 2  ;;  %v1003_v62 = vadd.f32 %v1002_v59, %v1001_v57  ;;  %vm998_vm4 = vcmask 122880  }
 0x19c   : > { %s225_s12 = scalar_lea.vmem [#allocation5], %s1164_s9  ;;  %s1811_s30 = sshll.u32 %s1711_s11, 5 }
 0x19d   : > { %v995_v63 = vadd.f32 %v994_v61, %v993_v58  ;;  %v1004_v0 = vrot.slane %v1003_v62, 2  ;;  %s1047_s14 = sshll.u32 %s225_s12, 4  ;;  %s1756_s10 = scalar_lea.hbm %s1807_s4, %s1811_s30  ;;  %s1048_s14 = int_to_ptr.vmem [resolvable:$true] %s1047_s14 }
 0x19e   : > { %s1017_s23 = scalar_lea.sflag [#allocation6], %s1706_s6  ;;  %s1403_s24 = scalar_lea.vmem %s1048_s14, 32 }
 0x19f   : > { %v996_v1 = vrot.slane %v995_v63, 1  ;;  %v1005_v2 = vadd.f32 %v1004_v0, %v1003_v62  ;;  %p1404_p2 = scmp.ne.s32.totalorder %s1048_s14, %s1403_s24  ;;  %s1512_s9 = smov [#allocation5]  }
 0x1a0   : > { %s1407_s13 = sshll.u32 %s1512_s9, 4  ;;  %s1408_s13 = int_to_ptr.vmem [resolvable:$false] %s1407_s13 }
 0x1a1   : > { %v997_v3 = vadd.f32 %v996_v1, %v995_v63  ;;  %v1006_v4 = vrot.slane %v1005_v2, 1  ;;  %p1405_p4 = pnand %p1404_p2, %p1589_p3  ;;  %s1409_s18 = scalar_lea.vmem %s1408_s13, 64 }
 0x1a2   : > { %p1410_p6 = scmp.lt.s32.totalorder %s1048_s14, %s1408_s13  ;;  %p1411_p7 = scmp.lt.s32.totalorder %s1409_s18, %s1403_s24 }
 0x1a3   : > { %999 = vst.msk [vmem:[%s225_s12] sm:$0x1] %vm998_vm4, %v997_v3  ;;  %v1007_v5 = vadd.f32 %v1006_v4, %v1005_v2  ;;  %p1406_p5 = pneg %p1405_p4 }
 0x1a4   : > { %p1412_p9 = por %p1411_p7, %p1410_p6 }
 0x1a5   : > { %1008 = vst.msk [vmem:[%s225_s12 + $0x1] sm:$0x1] %vm998_vm4, %v1007_v5 }
 0x1a6   : > { %p1413_p10 = pnand %p1412_p9, %p1406_p5 }
 0x1a8   : > { %1416 = shalt.err (!%p1413_p10)
}
 0x1a9   : > { %s1417_s11 = scalar_lea.hbm %s1756_s10, 32  ;;  %s1421_s27 = scalar_lea.hbm %s1807_s4, 128 }
 0x1aa   : > { %p1418_p11 = scmp.ne.s32.totalorder %s1756_s10, %s1417_s11  ;;  %p1422_p0 = scmp.lt.s32.totalorder %s1756_s10, %s1807_s4 }
 0x1ab   : > { %p1423_p1 = scmp.lt.s32.totalorder %s1421_s27, %s1417_s11 }
 0x1ac   : > { %p1419_p12 = pnand %p1418_p11, %p1589_p3 }
 0x1ad   : > { %p1424_p2 = por %p1423_p1, %p1422_p0 }
 0x1ae   : > { %p1420_p13 = pneg %p1419_p12 }
 0x1b0   : > { %p1425_p4 = pnand %p1424_p2, %p1420_p13 }
 0x1b2   : > { %1428 = shalt.err (!%p1425_p4)
}
 0x1b3   : > { %1275 = dma.vmem_to_hbm [thread:$0]  (%p1589_p3), %s1048_s14, 32, %s1756_s10, %s1017_s23  }
 0x1b4 PF: > { %p1285_p5 = scmp.ge.s32.totalorder %s1499_s22, 2  ;;  %s1059_s5 = sand.u32 1, %s1471_s15  }
 0x1b5   : > { %s1060_s8 = scalar_lea.sflag [#allocation4], %s1059_s5 }
 0x1b6   : > { %p1279_p6 = pnand %p1285_p5, %p1598_p8 }
 0x1b8   : > { %p1280_p7 = pneg %p1279_p6 }
 0x1ba   : > { %1462 = dma.done.wait (%p1280_p7), %s1060_s8, 32  }
 0x1bb   : > { %1464 = vsyncadd (%p1280_p7), %s1060_s8, 4294967264  ;;  %s1069_s24 = scalar_lea.sflag [#allocation6], %s1059_s5 }
 0x1bc   : > { %1466 = dma.done.wait (%p1280_p7), %s1069_s24, 32  }
 0x1bd   : > { %1468 = vsyncadd (%p1280_p7), %s1069_s24, 4294967264  ;;  %s21_s22 = sadd.s32 1, %s1499_s22   ;;  %s1812_s15 = smov %s1475_s16 }
 0x1be   : > { %p18_p9 = scmp.ge.s32.totalorder %s21_s22, 6   ;;  %s1813_s16 = smov %s1479_s17 }
 0x1bf   : > { %s1814_s17 = smov %s1607_s7  ;;  %s1815_s18 = smov %s1491_s20 }
 0x1c0   : > { %s1816_s19 = smov %s1495_s21  ;;  %s1817_s20 = smov %s1820_s25 }
 0x1c1   : > { %s1818_s21 = smov %s1824_s26  ;;  %20 = sbr.rel (!%p18_p9) target bundleno = 7 (0x7), region = 84 }
 0x1c6   :  { %1074 = vsyncpa [#allocation4], 1 }
 0x1c7   :  { %1076 = vsyncpa [#allocation4 + $0x1], 1 }
 0x1c8   :  { %1077 = vsyncpa [#allocation6], 1 }
 0x1c9   :  { %1079 = vsyncpa [#allocation6 + $0x1], 1 }

</bundles_post_ra>
